<compile_context>
chip_gen: v7x
topology: tpu7x:2x2x1
jax: 0.10.0
libtpu: 0.0.40
codegen_flags: <defaults>
</compile_context>

<pallas_src>
import jax
import jax.numpy as jnp
from jax.experimental import pallas as pl
from jax.experimental.pallas import tpu as pltpu

BN_EPS = 1e-5


# --------------------------------------------------------------------------- #
# Kernel: one batch tile, features on sublanes, batch on lanes.
# --------------------------------------------------------------------------- #
def _cnn_kernel(x_ref, w1_ref, t1_ref, w2_ref, t2_ref,
                wfc1_ref, bfc1_ref, wfc2_ref, bfc2_ref, o_ref):
    xT = x_ref[...]                                                   # (L, TB)

    # conv1 + BN1 (folded) + relu : single (16L, L) @ (L, TB) matmul
    h1 = jnp.maximum(
        jnp.dot(w1_ref[...], xT, preferred_element_type=jnp.float32)
        + t1_ref[...], 0.0)                                           # (16L, TB)

    # conv2 + BN2 (folded) + relu : banded (32L, 16L) @ (16L, TB) matmul
    h2 = jnp.maximum(
        jnp.dot(w2_ref[...], h1, preferred_element_type=jnp.float32)
        + t2_ref[...], 0.0)                                           # (32L, TB)

    # fc1 + relu : (2O, 32L) @ (32L, TB) — K=32L stays contiguous, no reshapes
    h3 = jnp.maximum(
        jnp.dot(wfc1_ref[...], h2, preferred_element_type=jnp.float32)
        + bfc1_ref[...], 0.0)                                         # (2O, TB)

    # fc2 : (O, 2O) @ (2O, TB) — lane-dense output block
    o_ref[...] = (jnp.dot(wfc2_ref[...], h3,
                          preferred_element_type=jnp.float32)
                  + bfc2_ref[...]).astype(o_ref.dtype)                # (O, TB)


# --------------------------------------------------------------------------- #
# Wrapper / parameter plumbing (plain JAX glue, fused under jit).
# --------------------------------------------------------------------------- #
def _round_up(x, m):
    return (x + m - 1) // m * m


def _conv_band_matrix(w, L):
    """Conv1d weight (Cout, Cin, K), stride 1, padding 1 -> dense (Cout*L, Cin*L)
    matrix acting on the channel-major / position-minor flattened activation."""
    Cout, Cin, K = w.shape
    l_out = jnp.arange(L)[:, None]                 # (L, 1)
    l_in = jnp.arange(L)[None, :]                  # (1, L)
    k = l_in - l_out + 1                           # tap index for pad=1
    valid = ((k >= 0) & (k < K)).astype(w.dtype)
    band = w[:, :, jnp.clip(k, 0, K - 1)] * valid[None, None]        # (Cout,Cin,L,L)
    return band.transpose(0, 2, 1, 3).reshape(Cout * L, Cin * L)


def _forward_impl(x, params):
    """x: (B, input_size) float32 -> (B, output_size) float32."""
    B, L = x.shape
    O = params["fc2_b"].shape[0]
    O2 = params["fc1_b"].shape[0]

    # ---- fold conv bias + eval-mode BN into conv weights / shifts ----------
    s1 = params["bn1_gamma"] * jax.lax.rsqrt(params["bn1_var"] + BN_EPS)   # (16,)
    t1 = s1 * (params["conv1_b"] - params["bn1_mean"]) + params["bn1_beta"]
    w1s = _conv_band_matrix(params["conv1_w"], L) * jnp.repeat(s1, L)[:, None]  # (16L, L)
    t1f = jnp.repeat(t1, L)[:, None]                                            # (16L, 1)

    s2 = params["bn2_gamma"] * jax.lax.rsqrt(params["bn2_var"] + BN_EPS)   # (32,)
    t2 = s2 * (params["conv2_b"] - params["bn2_mean"]) + params["bn2_beta"]
    w2s = _conv_band_matrix(params["conv2_w"], L) * jnp.repeat(s2, L)[:, None]  # (32L, 16L)
    t2f = jnp.repeat(t2, L)[:, None]                                            # (32L, 1)

    # PyTorch x.view(-1, 32*L) flatten order (channel-major, position-minor)
    # matches our feature ordering d*L + l, so fc weights are used as-is.
    wfc1 = params["fc1_w"]                                                       # (2O, 32L)
    bfc1 = params["fc1_b"][:, None]                                              # (2O, 1)
    wfc2 = params["fc2_w"]                                                       # (O, 2O)
    bfc2 = params["fc2_b"][:, None]                                              # (O, 1)

    # ---- batch tiling: batch on the 128-wide lane axis ----------------------
    TB = min(512, _round_up(max(B, 1), 128))
    Bp = _round_up(B, TB)
    xT = jnp.pad(x, ((0, Bp - B), (0, 0))).T                                     # (L, Bp)

    # Weights: constant block index -> DMA'd once, resident across the grid.
    full = lambda a: pl.BlockSpec(a.shape, lambda i: (0,) * a.ndim)

    flops = 2 * Bp * (16 * L * L + 32 * L * 16 * L + O2 * 32 * L + O * O2)
    bytes_accessed = 4 * (L * Bp + O * Bp + w1s.size + t1f.size + w2s.size
                          + t2f.size + wfc1.size + bfc1.size + wfc2.size + bfc2.size)

    outT = pl.pallas_call(
        _cnn_kernel,
        out_shape=jax.ShapeDtypeStruct((O, Bp), jnp.float32),
        grid=(Bp // TB,),
        in_specs=[
            pl.BlockSpec((L, TB), lambda i: (0, i)),    # x (lane-dense batch tile)
            full(w1s), full(t1f),                       # folded conv1 + BN1
            full(w2s), full(t2f),                       # folded conv2 + BN2
            full(wfc1), full(bfc1),                     # fc1
            full(wfc2), full(bfc2),                     # fc2
        ],
        out_specs=pl.BlockSpec((O, TB), lambda i: (0, i)),
        compiler_params=pltpu.CompilerParams(
            dimension_semantics=("parallel",)),         # megacore sharding on v7x
        cost_estimate=pl.CostEstimate(flops=flops, transcendentals=0,
                                      bytes_accessed=bytes_accessed),
    )(xT, w1s, t1f, w2s, t2f, wfc1, bfc1, wfc2, bfc2)

    return outT.T[:B]


cnn_salary_predict_forward = jax.jit(_forward_impl)


# --------------------------------------------------------------------------- #
# Pure-JAX reference (mirrors the PyTorch forward, eval-mode BN).
# --------------------------------------------------------------------------- #
def _reference_forward(x, params):
    B, L = x.shape
    w1 = params["conv1_w"][:, 0, :]
    xp = jnp.pad(x, ((0, 0), (1, 1)))
    patches1 = jnp.stack([xp[:, k:k + L] for k in range(3)], axis=-1)    # (B,L,3)
    c1 = jnp.einsum("blk,ck->bcl", patches1, w1) + params["conv1_b"][None, :, None]
    s1 = params["bn1_gamma"] / jnp.sqrt(params["bn1_var"] + BN_EPS)
    t1 = params["bn1_beta"] - params["bn1_mean"] * s1
    h1 = jax.nn.relu(c1 * s1[None, :, None] + t1[None, :, None])

    h1p = jnp.pad(h1, ((0, 0), (0, 0), (1, 1)))
    patches2 = jnp.stack([h1p[:, :, k:k + L] for k in range(3)], axis=-1)  # (B,16,L,3)
    c2 = jnp.einsum("bclk,dck->bdl", patches2, params["conv2_w"]) \
        + params["conv2_b"][None, :, None]
    s2 = params["bn2_gamma"] / jnp.sqrt(params["bn2_var"] + BN_EPS)
    t2 = params["bn2_beta"] - params["bn2_mean"] * s2
    h2 = jax.nn.relu(c2 * s2[None, :, None] + t2[None, :, None])

    flat = h2.reshape(B, -1)
    h3 = jax.nn.relu(flat @ params["fc1_w"].T + params["fc1_b"])
    return h3 @ params["fc2_w"].T + params["fc2_b"]


def _make_params(input_size, output_size, key):
    ks = jax.random.split(key, 16)
    O2 = output_size * 2
    return {
        "conv1_w": 0.2 * jax.random.normal(ks[0], (16, 1, 3), jnp.float32),
        "conv1_b": 0.1 * jax.random.normal(ks[1], (16,), jnp.float32),
        "bn1_gamma": 1.0 + 0.1 * jax.random.normal(ks[2], (16,), jnp.float32),
        "bn1_beta": 0.1 * jax.random.normal(ks[3], (16,), jnp.float32),
        "bn1_mean": 0.1 * jax.random.normal(ks[4], (16,), jnp.float32),
        "bn1_var": 1.0 + 0.2 * jax.random.uniform(ks[5], (16,), jnp.float32),
        "conv2_w": 0.1 * jax.random.normal(ks[6], (32, 16, 3), jnp.float32),
        "conv2_b": 0.1 * jax.random.normal(ks[7], (32,), jnp.float32),
        "bn2_gamma": 1.0 + 0.1 * jax.random.normal(ks[8], (32,), jnp.float32),
        "bn2_beta": 0.1 * jax.random.normal(ks[9], (32,), jnp.float32),
        "bn2_mean": 0.1 * jax.random.normal(ks[10], (32,), jnp.float32),
        "bn2_var": 1.0 + 0.2 * jax.random.uniform(ks[11], (32,), jnp.float32),
        "fc1_w": 0.05 * jax.random.normal(ks[12], (O2, 32 * input_size), jnp.float32),
        "fc1_b": 0.1 * jax.random.normal(ks[13], (O2,), jnp.float32),
        "fc2_w": 0.1 * jax.random.normal(ks[14], (output_size, O2), jnp.float32),
        "fc2_b": 0.1 * jax.random.normal(ks[15], (output_size,), jnp.float32),
    }


if __name__ == "__main__":
    input_size = 16     # length of the 1-D feature vector
    output_size = 8

    key = jax.random.PRNGKey(0)
    k_params, k_x1, k_x2 = jax.random.split(key, 3)
    params = _make_params(input_size, output_size, k_params)

    # Small batch (pads up to one 128-wide lane tile).
    x_small = jax.random.normal(k_x1, (2, input_size), jnp.float32)
    out_small = jax.block_until_ready(cnn_salary_predict_forward(x_small, params))
    ref_small = _reference_forward(x_small, params)
    assert out_small.shape == (2, output_size)
    assert jnp.allclose(out_small, ref_small, atol=1e-3, rtol=1e-3)

    # Larger ragged batch to exercise multi-step grid + padding path.
    x_big = jax.random.normal(k_x2, (600, input_size), jnp.float32)
    out_big = jax.block_until_ready(cnn_salary_predict_forward(x_big, params))
    ref_big = _reference_forward(x_big, params)
    assert out_big.shape == (600, output_size)
    assert jnp.allclose(out_big, ref_big, atol=1e-3, rtol=1e-3)

    print("KERNEL_OK")
</pallas_src>

<mosaic_0001>
module attributes {stable_mosaic.version = 11 : i64} {
  func.func @_cnn_kernel(%arg0: i32, %arg1: memref<16x128xf32, #tpu.memory_space<vmem>>, %arg2: memref<256x16xf32, #tpu.memory_space<vmem>>, %arg3: memref<256x1xf32, #tpu.memory_space<vmem>>, %arg4: memref<512x256xf32, #tpu.memory_space<vmem>>, %arg5: memref<512x1xf32, #tpu.memory_space<vmem>>, %arg6: memref<16x512xf32, #tpu.memory_space<vmem>>, %arg7: memref<16x1xf32, #tpu.memory_space<vmem>>, %arg8: memref<8x16xf32, #tpu.memory_space<vmem>>, %arg9: memref<8x1xf32, #tpu.memory_space<vmem>>, %arg10: memref<8x128xf32, #tpu.memory_space<vmem>>) attributes {dimension_semantics = [#tpu.dimension_semantics<parallel>], iteration_bounds = array<i64: 1>, scalar_prefetch = 0 : i64, scratch_operands = 0 : i64, tpu.core_type = #tpu.core_type<tc>, window_params = [{transform_indices = @transform_0, window_bounds = array<i64: 16, 128>}, {pipeline_mode = #tpu.pipeline_mode<synchronous>, transform_indices = @transform_1, window_bounds = array<i64: 256, 16>}, {pipeline_mode = #tpu.pipeline_mode<synchronous>, transform_indices = @transform_2, window_bounds = array<i64: 256, 1>}, {pipeline_mode = #tpu.pipeline_mode<synchronous>, transform_indices = @transform_3, window_bounds = array<i64: 512, 256>}, {pipeline_mode = #tpu.pipeline_mode<synchronous>, transform_indices = @transform_4, window_bounds = array<i64: 512, 1>}, {pipeline_mode = #tpu.pipeline_mode<synchronous>, transform_indices = @transform_5, window_bounds = array<i64: 16, 512>}, {pipeline_mode = #tpu.pipeline_mode<synchronous>, transform_indices = @transform_6, window_bounds = array<i64: 16, 1>}, {pipeline_mode = #tpu.pipeline_mode<synchronous>, transform_indices = @transform_7, window_bounds = array<i64: 8, 16>}, {pipeline_mode = #tpu.pipeline_mode<synchronous>, transform_indices = @transform_8, window_bounds = array<i64: 8, 1>}, {transform_indices = @transform_9, window_bounds = array<i64: 8, 128>}]} {
    %c0 = arith.constant 0 : index
    %c0_0 = arith.constant 0 : index
    %0 = vector.load %arg1[%c0, %c0_0] : memref<16x128xf32, #tpu.memory_space<vmem>>, vector<16x128xf32>
    %c0_1 = arith.constant 0 : index
    %c0_2 = arith.constant 0 : index
    %1 = vector.load %arg2[%c0_1, %c0_2] : memref<256x16xf32, #tpu.memory_space<vmem>>, vector<256x16xf32>
    %cst = arith.constant dense<0.000000e+00> : vector<256x128xf32>
    %2 = tpu.matmul %1, %0, %cst {dimension_numbers = #tpu.dot_dimension_numbers<[1], [0], [0], [1], [0, 0, 1, 1], [], []>} : vector<256x16xf32>, vector<16x128xf32>, vector<256x128xf32> -> vector<256x128xf32>
    %c0_3 = arith.constant 0 : index
    %c0_4 = arith.constant 0 : index
    %3 = vector.load %arg3[%c0_3, %c0_4] : memref<256x1xf32, #tpu.memory_space<vmem>>, vector<256x1xf32>
    %4 = vector.broadcast %3 : vector<256x1xf32> to vector<256x128xf32>
    %5 = arith.addf %2, %4 : vector<256x128xf32>
    %cst_5 = arith.constant 0.000000e+00 : f32
    %6 = vector.broadcast %cst_5 : f32 to vector<256x128xf32>
    %7 = arith.maximumf %5, %6 : vector<256x128xf32>
    %c0_6 = arith.constant 0 : index
    %c0_7 = arith.constant 0 : index
    %8 = vector.load %arg4[%c0_6, %c0_7] : memref<512x256xf32, #tpu.memory_space<vmem>>, vector<512x256xf32>
    %cst_8 = arith.constant dense<0.000000e+00> : vector<512x128xf32>
    %9 = tpu.matmul %8, %7, %cst_8 {dimension_numbers = #tpu.dot_dimension_numbers<[1], [0], [0], [1], [0, 0, 1, 1], [], []>} : vector<512x256xf32>, vector<256x128xf32>, vector<512x128xf32> -> vector<512x128xf32>
    %c0_9 = arith.constant 0 : index
    %c0_10 = arith.constant 0 : index
    %10 = vector.load %arg5[%c0_9, %c0_10] : memref<512x1xf32, #tpu.memory_space<vmem>>, vector<512x1xf32>
    %11 = vector.broadcast %10 : vector<512x1xf32> to vector<512x128xf32>
    %12 = arith.addf %9, %11 : vector<512x128xf32>
    %cst_11 = arith.constant 0.000000e+00 : f32
    %13 = vector.broadcast %cst_11 : f32 to vector<512x128xf32>
    %14 = arith.maximumf %12, %13 : vector<512x128xf32>
    %c0_12 = arith.constant 0 : index
    %c0_13 = arith.constant 0 : index
    %15 = vector.load %arg6[%c0_12, %c0_13] : memref<16x512xf32, #tpu.memory_space<vmem>>, vector<16x512xf32>
    %cst_14 = arith.constant dense<0.000000e+00> : vector<16x128xf32>
    %16 = tpu.matmul %15, %14, %cst_14 {dimension_numbers = #tpu.dot_dimension_numbers<[1], [0], [0], [1], [0, 0, 1, 1], [], []>} : vector<16x512xf32>, vector<512x128xf32>, vector<16x128xf32> -> vector<16x128xf32>
    %c0_15 = arith.constant 0 : index
    %c0_16 = arith.constant 0 : index
    %17 = vector.load %arg7[%c0_15, %c0_16] : memref<16x1xf32, #tpu.memory_space<vmem>>, vector<16x1xf32>
    %18 = vector.broadcast %17 : vector<16x1xf32> to vector<16x128xf32>
    %19 = arith.addf %16, %18 : vector<16x128xf32>
    %cst_17 = arith.constant 0.000000e+00 : f32
    %20 = vector.broadcast %cst_17 : f32 to vector<16x128xf32>
    %21 = arith.maximumf %19, %20 : vector<16x128xf32>
    %c0_18 = arith.constant 0 : index
    %c0_19 = arith.constant 0 : index
    %22 = vector.load %arg8[%c0_18, %c0_19] : memref<8x16xf32, #tpu.memory_space<vmem>>, vector<8x16xf32>
    %cst_20 = arith.constant dense<0.000000e+00> : vector<8x128xf32>
    %23 = tpu.matmul %22, %21, %cst_20 {dimension_numbers = #tpu.dot_dimension_numbers<[1], [0], [0], [1], [0, 0, 1, 1], [], []>} : vector<8x16xf32>, vector<16x128xf32>, vector<8x128xf32> -> vector<8x128xf32>
    %c0_21 = arith.constant 0 : index
    %c0_22 = arith.constant 0 : index
    %24 = vector.load %arg9[%c0_21, %c0_22] : memref<8x1xf32, #tpu.memory_space<vmem>>, vector<8x1xf32>
    %25 = vector.broadcast %24 : vector<8x1xf32> to vector<8x128xf32>
    %26 = arith.addf %23, %25 : vector<8x128xf32>
    %c0_23 = arith.constant 0 : index
    %c0_24 = arith.constant 0 : index
    %27 = vector.load %arg10[%c0_23, %c0_24] : memref<8x128xf32, #tpu.memory_space<vmem>>, vector<8x128xf32>
    tpu.vector_store %arg10[%c0_23, %c0_24], %26 {strides = array<i32>} : memref<8x128xf32, #tpu.memory_space<vmem>>, vector<8x128xf32>,
    return
  }
  func.func @transform_0(%arg0: i32) -> (i32, i32) {
    %c0_i32 = arith.constant 0 : i32
    %c0_i32_0 = arith.constant 0 : i32
    return %c0_i32, %arg0 : i32, i32
  }
  func.func @transform_1(%arg0: i32) -> (i32, i32) {
    %c0_i32 = arith.constant 0 : i32
    %c0_i32_0 = arith.constant 0 : i32
    %c0_i32_1 = arith.constant 0 : i32
    return %c0_i32, %c0_i32_0 : i32, i32
  }
  func.func @transform_2(%arg0: i32) -> (i32, i32) {
    %c0_i32 = arith.constant 0 : i32
    %c0_i32_0 = arith.constant 0 : i32
    %c0_i32_1 = arith.constant 0 : i32
    return %c0_i32, %c0_i32_0 : i32, i32
  }
  func.func @transform_3(%arg0: i32) -> (i32, i32) {
    %c0_i32 = arith.constant 0 : i32
    %c0_i32_0 = arith.constant 0 : i32
    %c0_i32_1 = arith.constant 0 : i32
    return %c0_i32, %c0_i32_0 : i32, i32
  }
  func.func @transform_4(%arg0: i32) -> (i32, i32) {
    %c0_i32 = arith.constant 0 : i32
    %c0_i32_0 = arith.constant 0 : i32
    %c0_i32_1 = arith.constant 0 : i32
    return %c0_i32, %c0_i32_0 : i32, i32
  }
  func.func @transform_5(%arg0: i32) -> (i32, i32) {
    %c0_i32 = arith.constant 0 : i32
    %c0_i32_0 = arith.constant 0 : i32
    %c0_i32_1 = arith.constant 0 : i32
    return %c0_i32, %c0_i32_0 : i32, i32
  }
  func.func @transform_6(%arg0: i32) -> (i32, i32) {
    %c0_i32 = arith.constant 0 : i32
    %c0_i32_0 = arith.constant 0 : i32
    %c0_i32_1 = arith.constant 0 : i32
    return %c0_i32, %c0_i32_0 : i32, i32
  }
  func.func @transform_7(%arg0: i32) -> (i32, i32) {
    %c0_i32 = arith.constant 0 : i32
    %c0_i32_0 = arith.constant 0 : i32
    %c0_i32_1 = arith.constant 0 : i32
    return %c0_i32, %c0_i32_0 : i32, i32
  }
  func.func @transform_8(%arg0: i32) -> (i32, i32) {
    %c0_i32 = arith.constant 0 : i32
    %c0_i32_0 = arith.constant 0 : i32
    %c0_i32_1 = arith.constant 0 : i32
    return %c0_i32, %c0_i32_0 : i32, i32
  }
  func.func @transform_9(%arg0: i32) -> (i32, i32) {
    %c0_i32 = arith.constant 0 : i32
    %c0_i32_0 = arith.constant 0 : i32
    return %c0_i32, %arg0 : i32, i32
  }
}

</mosaic_0001>

<bundles_post_ra>
// kernel: mul.37
= control target key start
LH: loop header
LB: loop body
LE: loop exit
PB: predicated region body
PF: predicated region fallthrough
CT: control target
= control target key end

     0   :  { %s67_s8 = smov 112   ;;  %s68_s11 = smov 80   ;;  %vm3_vm0 = vcmask 130048   ;;  %vm9_vm1 = vcmask 1048448   ;;  %vm15_vm2 = vcmask 917248   ;;  %vm21_vm3 = vcmask 786048   ;;  %s111_s0 = inlined_call_operand.vmem [shape: f32[32,16], index: 0, kind: input, shape index: {}]   ;;  %s112_s1 = inlined_call_operand.vmem [shape: f32[512], index: 1, kind: output, shape index: {}]  }
   0x1   :  { %v53_v0 = vld [vmem:[%s111_s0 + $0x7] ss:$8 sm:$0xf]   ;;  %v55_v1 = vld [vmem:[%s111_s0 + $0x5] ss:$8 sm:$0xf]  }
   0x2   :  { %7 = vrot.lane.b32.xlu0 %v53_v0, %s67_s8  ;;  %19 = vrot.lane.b32.xlu1 %v55_v1, %s68_s11  ;;  %v54_v2 = vld [vmem:[%s111_s0 + $0x6] ss:$8 sm:$0xf]   ;;  %v56_v3 = vld [vmem:[%s111_s0 + $0x4] ss:$8 sm:$0xf]  }
   0x3   :  { %s69_s16 = smov 96   ;;  %v2_v4 = vld [vmem:[%s111_s0] ss:$8 sm:$0xf]   ;;  %s70_s19 = smov 64   ;;  %vm27_vm4 = vcmask 654848  }
   0x4   :  { %v57_v5 = vld [vmem:[%s111_s0 + $0x3] ss:$8 sm:$0xf]   ;;  %4 = vst.msk [vmem:[#allocation0] sm:$0xf] %vm3_vm0, %v2_v4   ;;  %s71_s24 = smov 48  }
   0x5   :  { %v58_v6 = vld [vmem:[%s111_s0 + $0x2] ss:$8 sm:$0xf]   ;;  %s72_s25 = smov 32   ;;  %vm33_vm5 = vcmask 523648   ;;  %vm39_vm6 = vcmask 392448  }
   0x6   :  { %13 = vrot.lane.b32.xlu0 %v54_v2, %s69_s16  ;;  %25 = vrot.lane.b32.xlu1 %v56_v3, %s70_s19  ;;  %v59_v7 = vld [vmem:[%s111_s0 + $0x1] ss:$8 sm:$0xf]   ;;  %s73_s0 = smov 16   ;;  %vm45_vm7 = vcmask 261248  }
   0xa   :  { %31 = vrot.lane.b32.xlu0 %v57_v5, %s71_s24  ;;  %37 = vrot.lane.b32.xlu1 %v58_v6, %s72_s25 }
   0xe   :  { %43 = vrot.lane.b32.xlu0 %v59_v7, %s73_s0 }
  0x74   :  { %v8_v8 = vpop.permute.xlu0 %7   ;;  %v20_v9 = vpop.permute.xlu1 %19  }
  0x75   :  { %10 = vst.msk [vmem:[#allocation0] sm:$0xf] %vm9_vm1, %v8_v8  }
  0x78   :  { %v14_v10 = vpop.permute.xlu0 %13   ;;  %v26_v11 = vpop.permute.xlu1 %25  }
  0x79   :  { %16 = vst.msk [vmem:[#allocation0] sm:$0xf] %vm15_vm2, %v14_v10  }
  0x7a   :  { %22 = vst.msk [vmem:[#allocation0] sm:$0xf] %vm21_vm3, %v20_v9  }
  0x7b   :  { %28 = vst.msk [vmem:[#allocation0] sm:$0xf] %vm27_vm4, %v26_v11  }
  0x7c   :  { %v32_v12 = vpop.permute.xlu0 %31   ;;  %v38_v13 = vpop.permute.xlu1 %37  }
  0x7d   :  { %34 = vst.msk [vmem:[#allocation0] sm:$0xf] %vm33_vm5, %v32_v12  }
  0x7e   :  { %40 = vst.msk [vmem:[#allocation0] sm:$0xf] %vm39_vm6, %v38_v13  }
  0x80   :  { %v44_v14 = vpop.permute.xlu0 %43  }
  0x81   :  { %46 = vst.msk [vmem:[#allocation0] sm:$0xf] %vm45_vm7, %v44_v14  }
  0x88   :  { %v50_v15 = vld [vmem:[#allocation0] sm:$0xf] }
  0x89   :  { %52 = vst [vmem:[%s112_s1] sm:$0xf] %v50_v15 }

// kernel: mul.27
= control target key start
LH: loop header
LB: loop body
LE: loop exit
PB: predicated region body
PF: predicated region fallthrough
CT: control target
= control target key end

     0   :  { %s7_s6 = smov 3  ;;  %s21_s9 = smov 3  ;;  %vm4_vm0 = vcmask 130048   ;;  %vm11_vm1 = vcmask 1048448   ;;  %vm18_vm2 = vcmask 917248   ;;  %vm25_vm3 = vcmask 786048   ;;  %s119_s0 = inlined_call_operand.vmem [shape: f32[16,16], index: 0, kind: input, shape index: {}]   ;;  %s120_s1 = inlined_call_operand.vmem [shape: f32[256], index: 1, kind: output, shape index: {}]  }
   0x1   :  { %v61_v0 = vld [vmem:[%s119_s0 + $0x7] ss:$8 sm:%s7_s6]   ;;  %s75_s10 = smov 112   ;;  %v63_v1 = vld [vmem:[%s119_s0 + $0x5] ss:$8 sm:%s21_s9]   ;;  %s14_s13 = smov 3 }
   0x2   :  { %9 = vrot.lane.b32.xlu0 %v61_v0, %s75_s10  ;;  %s76_s14 = smov 80   ;;  %v62_v2 = vld [vmem:[%s119_s0 + $0x6] ss:$8 sm:%s14_s13]   ;;  %s28_s17 = smov 3  ;;  %vm32_vm4 = vcmask 654848   ;;  %vm39_vm5 = vcmask 523648  }
   0x3   :  { %23 = vrot.lane.b32.xlu1 %v63_v1, %s76_s14  ;;  %v64_v3 = vld [vmem:[%s119_s0 + $0x4] ss:$8 sm:%s28_s17]   ;;  %s35_s20 = smov 3  ;;  %s42_s21 = smov 3  ;;  %vm46_vm6 = vcmask 392448   ;;  %vm53_vm7 = vcmask 261248  }
   0x4   :  { %s77_s22 = smov 96   ;;  %s78_s23 = smov 64   ;;  %v65_v4 = vld [vmem:[%s119_s0 + $0x3] ss:$8 sm:%s35_s20]   ;;  %v66_v5 = vld [vmem:[%s119_s0 + $0x2] ss:$8 sm:%s42_s21]  }
   0x5   :  { %s2_s26 = smov 3  ;;  %s49_s29 = smov 3 }
   0x6   :  { %16 = vrot.lane.b32.xlu0 %v62_v2, %s77_s22  ;;  %v3_v6 = vld [vmem:[%s119_s0] ss:$8 sm:%s2_s26]   ;;  %s79_s3 = smov 48   ;;  %s80_s4 = smov 32  }
   0x7   :  { %30 = vrot.lane.b32.xlu1 %v64_v3, %s78_s23  ;;  %5 = vst.msk [vmem:[#allocation0] sm:$0x3] %vm4_vm0, %v3_v6   ;;  %v67_v7 = vld [vmem:[%s119_s0 + $0x1] ss:$8 sm:%s49_s29]   ;;  %s81_s0 = smov 16  }
   0xa   :  { %37 = vrot.lane.b32.xlu0 %v65_v4, %s79_s3 }
   0xb   :  { %44 = vrot.lane.b32.xlu1 %v66_v5, %s80_s4 }
   0xe   :  { %51 = vrot.lane.b32.xlu0 %v67_v7, %s81_s0 }
  0x74   :  { %v10_v8 = vpop.permute.xlu0 %9  }
  0x75   :  { %12 = vst.msk [vmem:[#allocation0] sm:$0x3] %vm11_vm1, %v10_v8   ;;  %v24_v9 = vpop.permute.xlu1 %23  }
  0x78   :  { %v17_v10 = vpop.permute.xlu0 %16  }
  0x79   :  { %19 = vst.msk [vmem:[#allocation0] sm:$0x3] %vm18_vm2, %v17_v10   ;;  %v31_v11 = vpop.permute.xlu1 %30  }
  0x7a   :  { %26 = vst.msk [vmem:[#allocation0] sm:$0x3] %vm25_vm3, %v24_v9  }
  0x7b   :  { %33 = vst.msk [vmem:[#allocation0] sm:$0x3] %vm32_vm4, %v31_v11  }
  0x7c   :  { %v38_v12 = vpop.permute.xlu0 %37  }
  0x7d   :  { %40 = vst.msk [vmem:[#allocation0] sm:$0x3] %vm39_vm5, %v38_v12   ;;  %v45_v13 = vpop.permute.xlu1 %44  }
  0x7e   :  { %47 = vst.msk [vmem:[#allocation0] sm:$0x3] %vm46_vm6, %v45_v13  }
  0x80   :  { %v52_v14 = vpop.permute.xlu0 %51  }
  0x81   :  { %54 = vst.msk [vmem:[#allocation0] sm:$0x3] %vm53_vm7, %v52_v14  }
  0x88   :  { %v58_v15 = vld [vmem:[#allocation0] sm:$0x3] }
  0x89   :  { %60 = vst [vmem:[%s120_s1] sm:$0x3] %v58_v15 }

// kernel: _forward_impl.1
= control target key start
LH: loop header
LB: loop body
LE: loop exit
PB: predicated region body
PF: predicated region fallthrough
CT: control target
= control target key end

     0   :  { %v2192_v0 = vmov 0   ;;  %vm258_vm0 = vcmask 130048   ;;  %vm2194_vm1 = vmmov 0   ;;  %s3341_s2 = inlined_call_operand.vmem [shape: f32[256,1], index: 2, kind: input, shape index: {}]   ;;  %s3342_s0 = inlined_call_operand.vmem [shape: f32[16,128], index: 0, kind: input, shape index: {}]   ;;  %s3343_s1 = inlined_call_operand.vmem [shape: f32[256,16], index: 1, kind: input, shape index: {}]   ;;  %s3344_s4 = inlined_call_operand.vmem [shape: f32[512,1], index: 4, kind: input, shape index: {}]   ;;  %s3345_s3 = inlined_call_operand.vmem [shape: f32[512,256], index: 3, kind: input, shape index: {}]   ;;  %s3346_s6 = inlined_call_operand.vmem [shape: f32[16,1], index: 6, kind: input, shape index: {}]   ;;  %s3347_s8 = inlined_call_operand.vmem [shape: f32[8,1], index: 8, kind: input, shape index: {}]   ;;  %s3348_s5 = inlined_call_operand.vmem [shape: f32[16,512], index: 5, kind: input, shape index: {}]   ;;  %s3349_s7 = inlined_call_operand.vmem [shape: f32[8,16], index: 7, kind: input, shape index: {}]   ;;  %s3350_s9 = inlined_call_operand.vmem [shape: f32[8,128], index: 9, kind: output, shape index: {}]  }
   0x1   :  { %2191 = vset.pattern.permute.xlu1 %v2192_v0  ;;  %2190 = vset.pattern.permute.xlu0 %v2192_v0  ;;  %v68_v1 = vld [vmem:[%s3341_s2 + $0x10] sm:$0xff]  ;;  %v66_v2 = vld [vmem:[%s3341_s2] sm:$0xff]  ;;  %v33_v4 = vld [vmem:[%s3342_s0 + $0x8] sm:$0xff] }
   0x2   :  { %v32_v3 = vld [vmem:[%s3342_s0] sm:$0xff]  ;;  %110 = vperm.xlu1 %2191, %v68_v1   ;;  %100 = vperm.xlu0 %2190, %v66_v2   ;;  %v69_v6 = vld [vmem:[%s3341_s2 + $0x18] sm:$0xff]  ;;  %v67_v8 = vld [vmem:[%s3341_s2 + $0x8] sm:$0xff] }
   0x3   :  { %v2035_v5 = vpack.c.bf16 %v33_v4, %v32_v3  ;;  %v34_v7 = vld [vmem:[%s3343_s1] sm:$0xff]  ;;  %v35_v9 = vld [vmem:[%s3343_s1 + $0x8] sm:$0xff]  ;;  %v36_v11 = vld [vmem:[%s3343_s1 + $0x10] sm:$0xff] }
   0x4   :  { %1980 = vmatprep.mubr.msk.f32.mxu0 %vm258_vm0, %v34_v7  ;;  %v71_v10 = vld [vmem:[%s3341_s2 + $0x28] sm:$0xff]  ;;  %v70_v12 = vld [vmem:[%s3341_s2 + $0x20] sm:$0xff]  ;;  %v37_v13 = vld [vmem:[%s3343_s1 + $0x18] sm:$0xff] }
   0x5   :  { %2036 = vmatprep.subr.bf16.mxu0 %v2035_v5  ;;  %v73_v14 = vld [vmem:[%s3341_s2 + $0x38] sm:$0xff]  ;;  %v38_v15 = vld [vmem:[%s3343_s1 + $0x20] sm:$0xff]  ;;  %v72_v16 = vld [vmem:[%s3341_s2 + $0x30] sm:$0xff] }
   0x6   :  { %2038 = vmatpush3.bf16.msra.mxu0 %v2035_v5  ;;  %115 = vperm.xlu1 %2191, %v69_v6   ;;  %v39_v17 = vld [vmem:[%s3343_s1 + $0x28] sm:$0xff]  ;;  %v40_v19 = vld [vmem:[%s3343_s1 + $0x30] sm:$0xff]  ;;  %v74_v20 = vld [vmem:[%s3341_s2 + $0x40] sm:$0xff] }
   0x7   :  { %105 = vperm.xlu0 %2190, %v67_v8   ;;  %v75_v18 = vld [vmem:[%s3341_s2 + $0x48] sm:$0xff]  ;;  %v41_v21 = vld [vmem:[%s3343_s1 + $0x38] sm:$0xff]  ;;  %v42_v23 = vld [vmem:[%s3343_s1 + $0x40] sm:$0xff] }
   0x8   :  { %v77_v22 = vld [vmem:[%s3341_s2 + $0x58] sm:$0xff]  ;;  %v76_v24 = vld [vmem:[%s3341_s2 + $0x50] sm:$0xff]  ;;  %v43_v25 = vld [vmem:[%s3343_s1 + $0x48] sm:$0xff] }
   0x9   :  { %1981 = vmatmul.mubr.msk.f32.vlgmr.msra.gmra.mrb[0].mxu0 %vm258_vm0, %v35_v9  ;;  %v79_v26 = vld [vmem:[%s3341_s2 + $0x68] sm:$0xff]  ;;  %v44_v27 = vld [vmem:[%s3343_s1 + $0x50] sm:$0xff]  ;;  %v78_v28 = vld [vmem:[%s3341_s2 + $0x60] sm:$0xff] }
   0xa   :  { %125 = vperm.xlu1 %2191, %v71_v10   ;;  %1983 = vmatprep.mubr.msk.f32.mxu0 %vm258_vm0, %v36_v11  ;;  %v45_v29 = vld [vmem:[%s3343_s1 + $0x58] sm:$0xff]  ;;  %v46_v31 = vld [vmem:[%s3343_s1 + $0x60] sm:$0xff]  ;;  %v80_v32 = vld [vmem:[%s3341_s2 + $0x70] sm:$0xff] }
   0xb   :  { %120 = vperm.xlu0 %2190, %v70_v12   ;;  %v81_v30 = vld [vmem:[%s3341_s2 + $0x78] sm:$0xff]  ;;  %v47_v33 = vld [vmem:[%s3343_s1 + $0x68] sm:$0xff]  ;;  %v48_v35 = vld [vmem:[%s3343_s1 + $0x70] sm:$0xff] }
   0xc   :  { %v83_v34 = vld [vmem:[%s3341_s2 + $0x88] sm:$0xff]  ;;  %v82_v36 = vld [vmem:[%s3341_s2 + $0x80] sm:$0xff]  ;;  %v49_v37 = vld [vmem:[%s3343_s1 + $0x78] sm:$0xff] }
   0xd   :  { %1984 = vmatmul.mubr.msk.f32.gmra.mrb[2].mxu0 %vm258_vm0, %v37_v13  ;;  %v85_v38 = vld [vmem:[%s3341_s2 + $0x98] sm:$0xff]  ;;  %v50_v39 = vld [vmem:[%s3343_s1 + $0x80] sm:$0xff]  ;;  %v84_v40 = vld [vmem:[%s3341_s2 + $0x90] sm:$0xff] }
   0xe   :  { %135 = vperm.xlu1 %2191, %v73_v14   ;;  %1986 = vmatprep.mubr.msk.f32.mxu0 %vm258_vm0, %v38_v15  ;;  %v51_v41 = vld [vmem:[%s3343_s1 + $0x88] sm:$0xff]  ;;  %v52_v43 = vld [vmem:[%s3343_s1 + $0x90] sm:$0xff]  ;;  %v86_v44 = vld [vmem:[%s3341_s2 + $0xa0] sm:$0xff] }
   0xf   :  { %130 = vperm.xlu0 %2190, %v72_v16   ;;  %v87_v42 = vld [vmem:[%s3341_s2 + $0xa8] sm:$0xff]  ;;  %v53_v45 = vld [vmem:[%s3343_s1 + $0x98] sm:$0xff]  ;;  %v54_v47 = vld [vmem:[%s3343_s1 + $0xa0] sm:$0xff] }
  0x10   :  { %v89_v46 = vld [vmem:[%s3341_s2 + $0xb8] sm:$0xff]  ;;  %v88_v48 = vld [vmem:[%s3341_s2 + $0xb0] sm:$0xff]  ;;  %v55_v49 = vld [vmem:[%s3343_s1 + $0xa8] sm:$0xff] }
  0x11   :  { %1987 = vmatmul.mubr.msk.f32.gmra.mrb[4].mxu0 %vm258_vm0, %v39_v17  ;;  %v91_v50 = vld [vmem:[%s3341_s2 + $0xc8] sm:$0xff]  ;;  %v56_v51 = vld [vmem:[%s3343_s1 + $0xb0] sm:$0xff]  ;;  %v90_v52 = vld [vmem:[%s3341_s2 + $0xc0] sm:$0xff] }
  0x12   :  { %145 = vperm.xlu1 %2191, %v75_v18   ;;  %1989 = vmatprep.mubr.msk.f32.mxu0 %vm258_vm0, %v40_v19  ;;  %v57_v53 = vld [vmem:[%s3343_s1 + $0xb8] sm:$0xff]  ;;  %v58_v55 = vld [vmem:[%s3343_s1 + $0xc0] sm:$0xff]  ;;  %v92_v56 = vld [vmem:[%s3341_s2 + $0xd0] sm:$0xff] }
  0x13   :  { %140 = vperm.xlu0 %2190, %v74_v20   ;;  %v93_v54 = vld [vmem:[%s3341_s2 + $0xd8] sm:$0xff]  ;;  %v59_v57 = vld [vmem:[%s3343_s1 + $0xc8] sm:$0xff]  ;;  %v60_v59 = vld [vmem:[%s3343_s1 + $0xd0] sm:$0xff] }
  0x14   :  { %v95_v58 = vld [vmem:[%s3341_s2 + $0xe8] sm:$0xff]  ;;  %v94_v60 = vld [vmem:[%s3341_s2 + $0xe0] sm:$0xff]  ;;  %v61_v61 = vld [vmem:[%s3343_s1 + $0xd8] sm:$0xff] }
  0x15   :  { %1990 = vmatmul.mubr.msk.f32.gmra.mrb[6].mxu0 %vm258_vm0, %v41_v21  ;;  %v97_v62 = vld [vmem:[%s3341_s2 + $0xf8] sm:$0xff]  ;;  %v62_v63 = vld [vmem:[%s3343_s1 + $0xe0] sm:$0xff]  ;;  %v96_v0 = vld [vmem:[%s3341_s2 + $0xf0] sm:$0xff] }
  0x16   :  { %155 = vperm.xlu1 %2191, %v77_v22   ;;  %1992 = vmatprep.mubr.msk.f32.mxu0 %vm258_vm0, %v42_v23  ;;  %v63_v1 = vld [vmem:[%s3343_s1 + $0xe8] sm:$0xff]  ;;  %v64_v3 = vld [vmem:[%s3343_s1 + $0xf0] sm:$0xff]  ;;  %v756_v4 = vld [vmem:[%s3344_s4 + $0x80] sm:$0xff]  ;;  %v3351_v23 = vmov 0.0|0.0  }
  0x17   :  { %150 = vperm.xlu0 %2190, %v76_v24   ;;  %v757_v2 = vld [vmem:[%s3344_s4 + $0x88] sm:$0xff]  ;;  %v65_v5 = vld [vmem:[%s3343_s1 + $0xf8] sm:$0xff]  ;;  %v740_v7 = vld [vmem:[%s3344_s4] sm:$0xff]  ;;  %2039 = vmatprep.subr.bf16.mxu0 %v3351_v23 }
  0x18   :  { %v741_v6 = vld [vmem:[%s3344_s4 + $0x8] sm:$0xff]  ;;  %v759_v8 = vld [vmem:[%s3344_s4 + $0x98] sm:$0xff]  ;;  %v758_v9 = vld [vmem:[%s3344_s4 + $0x90] sm:$0xff]  ;;  %2154 = vmatprep.subr.bf16.mxu1 %v3351_v23 }
  0x19   :  { %1993 = vmatmul.mubr.msk.f32.gmra.mrb[8].mxu0 %vm258_vm0, %v43_v25  ;;  %v743_v10 = vld [vmem:[%s3344_s4 + $0x18] sm:$0xff]  ;;  %v742_v11 = vld [vmem:[%s3344_s4 + $0x10] sm:$0xff]  ;;  %v761_v12 = vld [vmem:[%s3344_s4 + $0xa8] sm:$0xff] }
  0x1a   :  { %165 = vperm.xlu1 %2191, %v79_v26   ;;  %1995 = vmatprep.mubr.msk.f32.mxu0 %vm258_vm0, %v44_v27  ;;  %v760_v13 = vld [vmem:[%s3344_s4 + $0xa0] sm:$0xff]  ;;  %v745_v14 = vld [vmem:[%s3344_s4 + $0x28] sm:$0xff]  ;;  %v763_v16 = vld [vmem:[%s3344_s4 + $0xb8] sm:$0xff] }
  0x1b   :  { %160 = vperm.xlu0 %2190, %v78_v28   ;;  %v744_v15 = vld [vmem:[%s3344_s4 + $0x20] sm:$0xff]  ;;  %v762_v17 = vld [vmem:[%s3344_s4 + $0xb0] sm:$0xff]  ;;  %v747_v18 = vld [vmem:[%s3344_s4 + $0x38] sm:$0xff] }
  0x1c   :  { %v746_v19 = vld [vmem:[%s3344_s4 + $0x30] sm:$0xff]  ;;  %v765_v20 = vld [vmem:[%s3344_s4 + $0xc8] sm:$0xff]  ;;  %v764_v21 = vld [vmem:[%s3344_s4 + $0xc0] sm:$0xff] }
  0x1d   :  { %1996 = vmatmul.mubr.msk.f32.gmra.mrb[10].mxu0 %vm258_vm0, %v45_v29  ;;  %v749_v22 = vld [vmem:[%s3344_s4 + $0x48] sm:$0xff]  ;;  %v748_v24 = vld [vmem:[%s3344_s4 + $0x40] sm:$0xff]  ;;  %v767_v25 = vld [vmem:[%s3344_s4 + $0xd8] sm:$0xff] }
  0x1e   :  { %175 = vperm.xlu1 %2191, %v81_v30   ;;  %1998 = vmatprep.mubr.msk.f32.mxu0 %vm258_vm0, %v46_v31  ;;  %v766_v26 = vld [vmem:[%s3344_s4 + $0xd0] sm:$0xff]  ;;  %v751_v27 = vld [vmem:[%s3344_s4 + $0x58] sm:$0xff]  ;;  %v769_v29 = vld [vmem:[%s3344_s4 + $0xe8] sm:$0xff] }
  0x1f   :  { %170 = vperm.xlu0 %2190, %v80_v32   ;;  %v750_v28 = vld [vmem:[%s3344_s4 + $0x50] sm:$0xff]  ;;  %v768_v30 = vld [vmem:[%s3344_s4 + $0xe0] sm:$0xff]  ;;  %v753_v31 = vld [vmem:[%s3344_s4 + $0x68] sm:$0xff] }
  0x20   :  { %v752_v32 = vld [vmem:[%s3344_s4 + $0x60] sm:$0xff] }
  0x21   :  { %1999 = vmatmul.mubr.msk.f32.gmra.mrb[12].mxu0 %vm258_vm0, %v47_v33  ;;  %v771_v33 = vld [vmem:[%s3344_s4 + $0xf8] sm:$0xff] }
  0x22   :  { %185 = vperm.xlu1 %2191, %v83_v34   ;;  %2001 = vmatprep.mubr.msk.f32.mxu0 %vm258_vm0, %v48_v35  ;;  %v770_v34 = vld [vmem:[%s3344_s4 + $0xf0] sm:$0xff]  ;;  %v755_v35 = vld [vmem:[%s3344_s4 + $0x78] sm:$0xff] }
  0x23   :  { %180 = vperm.xlu0 %2190, %v82_v36   ;;  %v754_v36 = vld [vmem:[%s3344_s4 + $0x70] sm:$0xff] }
  0x25   :  { %2002 = vmatmul.mubr.msk.f32.gmra.mrb[14].mxu0 %vm258_vm0, %v49_v37  ;;  %v789_v37 = vld [vmem:[%s3344_s4 + $0x188] sm:$0xff] }
  0x26   :  { %195 = vperm.xlu1 %2191, %v85_v38   ;;  %2004 = vmatprep.mubr.msk.f32.mxu0 %vm258_vm0, %v50_v39  ;;  %v788_v38 = vld [vmem:[%s3344_s4 + $0x180] sm:$0xff]  ;;  %v773_v39 = vld [vmem:[%s3344_s4 + $0x108] sm:$0xff] }
  0x27   :  { %190 = vperm.xlu0 %2190, %v84_v40   ;;  %v772_v40 = vld [vmem:[%s3344_s4 + $0x100] sm:$0xff] }
  0x29   :  { %2005 = vmatmul.mubr.msk.f32.gmra.mrb[16].mxu0 %vm258_vm0, %v51_v41  ;;  %v791_v41 = vld [vmem:[%s3344_s4 + $0x198] sm:$0xff] }
  0x2a   :  { %205 = vperm.xlu1 %2191, %v87_v42   ;;  %2007 = vmatprep.mubr.msk.f32.mxu0 %vm258_vm0, %v52_v43  ;;  %v790_v42 = vld [vmem:[%s3344_s4 + $0x190] sm:$0xff]  ;;  %v775_v43 = vld [vmem:[%s3344_s4 + $0x118] sm:$0xff] }
  0x2b   :  { %200 = vperm.xlu0 %2190, %v86_v44   ;;  %v774_v44 = vld [vmem:[%s3344_s4 + $0x110] sm:$0xff] }
  0x2d   :  { %2008 = vmatmul.mubr.msk.f32.gmra.mrb[18].mxu0 %vm258_vm0, %v53_v45  ;;  %v793_v45 = vld [vmem:[%s3344_s4 + $0x1a8] sm:$0xff] }
  0x2e   :  { %215 = vperm.xlu1 %2191, %v89_v46   ;;  %2010 = vmatprep.mubr.msk.f32.mxu0 %vm258_vm0, %v54_v47  ;;  %v792_v46 = vld [vmem:[%s3344_s4 + $0x1a0] sm:$0xff]  ;;  %v777_v47 = vld [vmem:[%s3344_s4 + $0x128] sm:$0xff] }
  0x2f   :  { %210 = vperm.xlu0 %2190, %v88_v48   ;;  %v776_v48 = vld [vmem:[%s3344_s4 + $0x120] sm:$0xff] }
  0x31   :  { %2011 = vmatmul.mubr.msk.f32.gmra.mrb[20].mxu0 %vm258_vm0, %v55_v49  ;;  %v795_v49 = vld [vmem:[%s3344_s4 + $0x1b8] sm:$0xff] }
  0x32   :  { %225 = vperm.xlu1 %2191, %v91_v50   ;;  %2013 = vmatprep.mubr.msk.f32.mxu0 %vm258_vm0, %v56_v51  ;;  %v794_v50 = vld [vmem:[%s3344_s4 + $0x1b0] sm:$0xff]  ;;  %v779_v51 = vld [vmem:[%s3344_s4 + $0x138] sm:$0xff] }
  0x33   :  { %220 = vperm.xlu0 %2190, %v90_v52   ;;  %v778_v52 = vld [vmem:[%s3344_s4 + $0x130] sm:$0xff] }
  0x35   :  { %2014 = vmatmul.mubr.msk.f32.gmra.mrb[22].mxu0 %vm258_vm0, %v57_v53  ;;  %v797_v53 = vld [vmem:[%s3344_s4 + $0x1c8] sm:$0xff] }
  0x36   :  { %235 = vperm.xlu1 %2191, %v93_v54   ;;  %2016 = vmatprep.mubr.msk.f32.mxu0 %vm258_vm0, %v58_v55  ;;  %v796_v54 = vld [vmem:[%s3344_s4 + $0x1c0] sm:$0xff]  ;;  %v665_v55 = vld [vmem:[%s3345_s3 + $0x1a8] sm:$0xff] }
  0x37   :  { %230 = vperm.xlu0 %2190, %v92_v56   ;;  %v613_v56 = vld [vmem:[%s3345_s3 + $0x8] sm:$0xff]  ;;  %1318 = vmatprep.mubr.f32.mxu1 %v665_v55 }
  0x39   :  { %2017 = vmatmul.mubr.msk.f32.gmra.mrb[24].mxu0 %vm258_vm0, %v59_v57  ;;  %v781_v57 = vld [vmem:[%s3344_s4 + $0x148] sm:$0xff] }
  0x3a   :  { %245 = vperm.xlu1 %2191, %v95_v58   ;;  %2019 = vmatprep.mubr.msk.f32.mxu0 %vm258_vm0, %v60_v59  ;;  %v780_v58 = vld [vmem:[%s3344_s4 + $0x140] sm:$0xff]  ;;  %v799_v59 = vld [vmem:[%s3344_s4 + $0x1d8] sm:$0xff] }
  0x3b   :  { %240 = vperm.xlu0 %2190, %v94_v60   ;;  %v798_v60 = vld [vmem:[%s3344_s4 + $0x1d0] sm:$0xff] }
  0x3d   :  { %2020 = vmatmul.mubr.msk.f32.gmra.mrb[26].mxu0 %vm258_vm0, %v61_v61  ;;  %v783_v61 = vld [vmem:[%s3344_s4 + $0x158] sm:$0xff] }
  0x3e   :  { %255 = vperm.xlu1 %2191, %v97_v62   ;;  %2022 = vmatprep.mubr.msk.f32.mxu0 %vm258_vm0, %v62_v63  ;;  %v782_v62 = vld [vmem:[%s3344_s4 + $0x150] sm:$0xff]  ;;  %v801_v63 = vld [vmem:[%s3344_s4 + $0x1e8] sm:$0xff] }
  0x3f   :  { %250 = vperm.xlu0 %2190, %v96_v0   ;;  %v800_v0 = vld [vmem:[%s3344_s4 + $0x1e0] sm:$0xff] }
  0x41   :  { %2023 = vmatmul.mubr.msk.f32.gmra.mrb[28].mxu0 %vm258_vm0, %v63_v1  ;;  %v785_v1 = vld [vmem:[%s3344_s4 + $0x168] sm:$0xff] }
  0x42   :  { %891 = vperm.xlu1 %2191, %v757_v2   ;;  %2025 = vmatprep.mubr.msk.f32.mxu0 %vm258_vm0, %v64_v3  ;;  %v784_v2 = vld [vmem:[%s3344_s4 + $0x160] sm:$0xff]  ;;  %v803_v3 = vld [vmem:[%s3344_s4 + $0x1f8] sm:$0xff] }
  0x43   :  { %886 = vperm.xlu0 %2190, %v756_v4   ;;  %v802_v4 = vld [vmem:[%s3344_s4 + $0x1f0] sm:$0xff] }
  0x45   :  { %2026 = vmatmul.mubr.msk.f32.gmra.mrb[30].mxu0 %vm258_vm0, %v65_v5  ;;  %v787_v5 = vld [vmem:[%s3344_s4 + $0x178] sm:$0xff] }
  0x46   :  { %811 = vperm.xlu1 %2191, %v741_v6   ;;  %1188 = vmatprep.mubr.f32.mxu0 %v613_v56  ;;  %v786_v6 = vld [vmem:[%s3344_s4 + $0x170] sm:$0xff] }
  0x47   :  { %806 = vperm.xlu0 %2190, %v740_v7  }
  0x4a   :  { %901 = vperm.xlu1 %2191, %v759_v8  }
  0x4b   :  { %896 = vperm.xlu0 %2190, %v758_v9   ;;  %v1582_v9 = vld [vmem:[%s3346_s6 + $0x8] sm:$0xff] }
  0x4e   :  { %821 = vperm.xlu1 %2191, %v743_v10   ;;  %v1581_v10 = vld [vmem:[%s3346_s6] sm:$0xff] }
  0x4f   :  { %816 = vperm.xlu0 %2190, %v742_v11  }
  0x52   :  { %911 = vperm.xlu1 %2191, %v761_v12   ;;  %v1746_v12 = vld [vmem:[%s3347_s8] sm:$0xff] }
  0x53   :  { %906 = vperm.xlu0 %2190, %v760_v13  }
  0x56   :  { %831 = vperm.xlu1 %2191, %v745_v14  }
  0x57   :  { %826 = vperm.xlu0 %2190, %v744_v15  }
  0x5a   :  { %921 = vperm.xlu1 %2191, %v763_v16  }
  0x5b   :  { %916 = vperm.xlu0 %2190, %v762_v17  }
  0x5e   :  { %841 = vperm.xlu1 %2191, %v747_v18  }
  0x5f   :  { %836 = vperm.xlu0 %2190, %v746_v19  }
  0x62   :  { %931 = vperm.xlu1 %2191, %v765_v20  }
  0x63   :  { %926 = vperm.xlu0 %2190, %v764_v21  }
  0x66   :  { %851 = vperm.xlu1 %2191, %v749_v22  }
  0x67   :  { %846 = vperm.xlu0 %2190, %v748_v24  }
  0x6a   :  { %941 = vperm.xlu1 %2191, %v767_v25  }
  0x6b   :  { %936 = vperm.xlu0 %2190, %v766_v26  }
  0x6e   :  { %861 = vperm.xlu1 %2191, %v751_v27  }
  0x6f   :  { %856 = vperm.xlu0 %2190, %v750_v28  }
  0x72   :  { %951 = vperm.xlu1 %2191, %v769_v29  }
  0x73   :  { %946 = vperm.xlu0 %2190, %v768_v30  }
  0x76   :  { %871 = vperm.xlu1 %2191, %v753_v31  }
  0x77   :  { %866 = vperm.xlu0 %2190, %v752_v32  }
  0x7a   :  { %961 = vperm.xlu1 %2191, %v771_v33  }
  0x7b   :  { %956 = vperm.xlu0 %2190, %v770_v34  }
  0x7e   :  { %881 = vperm.xlu1 %2191, %v755_v35  }
  0x7f   :  { %876 = vperm.xlu0 %2190, %v754_v36  }
  0x81   :  { %v111_v7 = vpop.permute.xlu1 %110  ;;  %v101_v8 = vpop.permute.xlu0 %100 }
  0x82   :  { %1051 = vperm.xlu1 %2191, %v789_v37  }
  0x83   :  { %1046 = vperm.xlu0 %2190, %v788_v38  }
  0x85   :  { %v116_v11 = vpop.permute.xlu1 %115 }
  0x86   :  { %971 = vperm.xlu1 %2191, %v773_v39   ;;  %v106_v13 = vpop.permute.xlu0 %105 }
  0x87   :  { %966 = vperm.xlu0 %2190, %v772_v40  }
  0x89   :  { %v126_v14 = vpop.permute.xlu1 %125 }
  0x8a   :  { %1061 = vperm.xlu1 %2191, %v791_v41   ;;  %v121_v15 = vpop.permute.xlu0 %120 }
  0x8b   :  { %1056 = vperm.xlu0 %2190, %v790_v42  }
  0x8d   :  { %v136_v16 = vpop.permute.xlu1 %135 }
  0x8e   :  { %981 = vperm.xlu1 %2191, %v775_v43   ;;  %v131_v17 = vpop.permute.xlu0 %130 }
  0x8f   :  { %976 = vperm.xlu0 %2190, %v774_v44  }
  0x91   :  { %v146_v18 = vpop.permute.xlu1 %145 }
  0x92   :  { %1071 = vperm.xlu1 %2191, %v793_v45   ;;  %v141_v19 = vpop.permute.xlu0 %140 }
  0x93   :  { %1066 = vperm.xlu0 %2190, %v792_v46  }
  0x95   :  { %v156_v20 = vpop.permute.xlu1 %155 }
  0x96   :  { %991 = vperm.xlu1 %2191, %v777_v47   ;;  %v151_v22 = vpop.permute.xlu0 %150 }
  0x97   :  { %986 = vperm.xlu0 %2190, %v776_v48  }
  0x99   :  { %v166_v32 = vpop.permute.xlu1 %165 }
  0x9a   :  { %1081 = vperm.xlu1 %2191, %v795_v49   ;;  %v161_v35 = vpop.permute.xlu0 %160 }
  0x9b   :  { %1076 = vperm.xlu0 %2190, %v794_v50  }
  0x9d   :  { %v176_v44 = vpop.permute.xlu1 %175 }
  0x9e   :  { %1001 = vperm.xlu1 %2191, %v779_v51   ;;  %v171_v47 = vpop.permute.xlu0 %170 }
  0x9f   :  { %996 = vperm.xlu0 %2190, %v778_v52  }
  0xa2   :  { %1091 = vperm.xlu1 %2191, %v797_v53  }
  0xa3   :  { %1086 = vperm.xlu0 %2190, %v796_v54  }
  0xa6   :  { %1011 = vperm.xlu1 %2191, %v781_v57   ;;  %v186_v57 = vpop.permute.xlu1 %185 }
  0xa7   :  { %1006 = vperm.xlu0 %2190, %v780_v58  }
  0xaa   :  { %1101 = vperm.xlu1 %2191, %v799_v59  }
  0xab   :  { %1096 = vperm.xlu0 %2190, %v798_v60   ;;  %v181_v60 = vpop.permute.xlu0 %180 }
  0xae   :  { %1021 = vperm.xlu1 %2191, %v783_v61  }
  0xaf   :  { %1016 = vperm.xlu0 %2190, %v782_v62  }
  0xb2   :  { %1111 = vperm.xlu1 %2191, %v801_v63  }
  0xb3   :  { %1106 = vperm.xlu0 %2190, %v800_v0  }
  0xb6   :  { %1031 = vperm.xlu1 %2191, %v785_v1  }
  0xb7   :  { %1026 = vperm.xlu0 %2190, %v784_v2  }
  0xba   :  { %1121 = vperm.xlu1 %2191, %v803_v3  }
  0xbb   :  { %1116 = vperm.xlu0 %2190, %v802_v4  }
  0xbe   :  { %1041 = vperm.xlu1 %2191, %v787_v5   ;;  %v196_v5 = vpop.permute.xlu1 %195 }
  0xbf   :  { %1036 = vperm.xlu0 %2190, %v786_v6  }
  0xc2   :  { %1590 = vperm.xlu1 %2191, %v1582_v9  }
  0xc3   :  { %1585 = vperm.xlu0 %2190, %v1581_v10  }
  0xc7   :  { %1749 = vperm.xlu0 %2190, %v1746_v12  }
  0xdc   :  { %v1982_v21 = vpop.f32.mrb[0].mxu0 }
  0xdd   :  { %v427_v24 = vadd.f32 %v1982_v21, %v106_v13  ;;  %v421_v25 = vpop.f32.mrb[1].mxu0 }
  0xde   :  { %v422_v26 = vadd.f32 %v421_v25, %v101_v8  ;;  %v191_v8 = vpop.permute.xlu0 %190 }
  0xdf   :  { %v581_v27 = vmax.f32 %v427_v24, 0.0 }
  0xe0   :  { %v580_v28 = vmax.f32 %v422_v26, 0.0  ;;  %v1985_v29 = vpop.f32.mrb[2].mxu0 }
  0xe1   :  { %v437_v30 = vadd.f32 %v1985_v29, %v116_v11  ;;  %v431_v31 = vpop.f32.mrb[3].mxu0 }
  0xe2   :  { %v2040_v33 = vpack.c.bf16 %v581_v27, %v580_v28  ;;  %v432_v34 = vadd.f32 %v431_v31, %v111_v7  ;;  %v201_v21 = vpop.permute.xlu0 %200 }
  0xe3   :  { %v583_v36 = vmax.f32 %v437_v30, 0.0 }
  0xe4   :  { %v582_v37 = vmax.f32 %v432_v34, 0.0  ;;  %v1988_v38 = vpop.f32.mrb[4].mxu0  ;;  %2041 = vmatpush1.bf16.msra.mxu0 %v2040_v33  ;;  %2170 = vmatpush1.bf16.msra.mxu1 %v2040_v33 }
  0xe5   :  { %v447_v39 = vadd.f32 %v1988_v38, %v126_v14  ;;  %v441_v40 = vpop.f32.mrb[5].mxu0  ;;  %2042 = vmatprep.subr.bf16.mxu0 %v3351_v23  ;;  %2155 = vmatprep.subr.bf16.mxu1 %v3351_v23 }
  0xe6   :  { %v2043_v41 = vpack.c.bf16 %v583_v36, %v582_v37  ;;  %v442_v42 = vadd.f32 %v441_v40, %v121_v15  ;;  %v211_v34 = vpop.permute.xlu0 %210 }
  0xe7   :  { %v585_v43 = vmax.f32 %v447_v39, 0.0 }
  0xe8   :  { %v584_v45 = vmax.f32 %v442_v42, 0.0  ;;  %v1991_v46 = vpop.f32.mrb[6].mxu0  ;;  %2044 = vmatpush1.bf16.msra.mxu0 %v2043_v41  ;;  %2171 = vmatpush1.bf16.msra.mxu1 %v2043_v41 }
  0xe9   :  { %v457_v48 = vadd.f32 %v1991_v46, %v136_v16  ;;  %v451_v49 = vpop.f32.mrb[7].mxu0  ;;  %2045 = vmatprep.subr.bf16.mxu0 %v3351_v23  ;;  %2156 = vmatprep.subr.bf16.mxu1 %v3351_v23 }
  0xea   :  { %v2046_v50 = vpack.c.bf16 %v585_v43, %v584_v45  ;;  %v452_v51 = vadd.f32 %v451_v49, %v131_v17 }
  0xeb   :  { %v587_v52 = vmax.f32 %v457_v48, 0.0 }
  0xec   :  { %v586_v53 = vmax.f32 %v452_v51, 0.0  ;;  %v1994_v54 = vpop.f32.mrb[8].mxu0  ;;  %2047 = vmatpush1.bf16.msra.mxu0 %v2046_v50  ;;  %2172 = vmatpush1.bf16.msra.mxu1 %v2046_v50 }
  0xed   :  { %v467_v55 = vadd.f32 %v1994_v54, %v146_v18  ;;  %v461_v56 = vpop.f32.mrb[9].mxu0  ;;  %2048 = vmatprep.subr.bf16.mxu0 %v3351_v23  ;;  %2157 = vmatprep.subr.bf16.mxu1 %v3351_v23  ;;  %v206_v18 = vpop.permute.xlu1 %205 }
  0xee   :  { %v2049_v58 = vpack.c.bf16 %v587_v52, %v586_v53  ;;  %v462_v59 = vadd.f32 %v461_v56, %v141_v19 }
  0xef   :  { %v589_v61 = vmax.f32 %v467_v55, 0.0 }
  0xf0   :  { %v588_v62 = vmax.f32 %v462_v59, 0.0  ;;  %v1997_v63 = vpop.f32.mrb[10].mxu0  ;;  %2050 = vmatpush1.bf16.msra.mxu0 %v2049_v58  ;;  %2173 = vmatpush1.bf16.msra.mxu1 %v2049_v58 }
  0xf1   :  { %v477_v0 = vadd.f32 %v1997_v63, %v156_v20  ;;  %v471_v1 = vpop.f32.mrb[11].mxu0  ;;  %2051 = vmatprep.subr.bf16.mxu0 %v3351_v23  ;;  %2158 = vmatprep.subr.bf16.mxu1 %v3351_v23  ;;  %v216_v31 = vpop.permute.xlu1 %215 }
  0xf2   :  { %v2052_v2 = vpack.c.bf16 %v589_v61, %v588_v62  ;;  %v472_v3 = vadd.f32 %v471_v1, %v151_v22 }
  0xf3   :  { %v591_v4 = vmax.f32 %v477_v0, 0.0 }
  0xf4   :  { %v590_v6 = vmax.f32 %v472_v3, 0.0  ;;  %v2000_v7 = vpop.f32.mrb[12].mxu0  ;;  %2053 = vmatpush1.bf16.msra.mxu0 %v2052_v2  ;;  %2174 = vmatpush1.bf16.msra.mxu1 %v2052_v2 }
  0xf5   :  { %v487_v9 = vadd.f32 %v2000_v7, %v166_v32  ;;  %v481_v10 = vpop.f32.mrb[13].mxu0  ;;  %2054 = vmatprep.subr.bf16.mxu0 %v3351_v23  ;;  %2159 = vmatprep.subr.bf16.mxu1 %v3351_v23 }
  0xf6   :  { %v2055_v11 = vpack.c.bf16 %v591_v4, %v590_v6  ;;  %v482_v12 = vadd.f32 %v481_v10, %v161_v35 }
  0xf7   :  { %v593_v13 = vmax.f32 %v487_v9, 0.0 }
  0xf8   :  { %v592_v14 = vmax.f32 %v482_v12, 0.0  ;;  %v2003_v15 = vpop.f32.mrb[14].mxu0  ;;  %2056 = vmatpush1.bf16.msra.mxu0 %v2055_v11  ;;  %2175 = vmatpush1.bf16.msra.mxu1 %v2055_v11 }
  0xf9   :  { %v497_v16 = vadd.f32 %v2003_v15, %v176_v44  ;;  %v491_v17 = vpop.f32.mrb[15].mxu0  ;;  %2057 = vmatprep.subr.bf16.mxu0 %v3351_v23  ;;  %2160 = vmatprep.subr.bf16.mxu1 %v3351_v23  ;;  %v226_v44 = vpop.permute.xlu1 %225 }
  0xfa   :  { %v2058_v19 = vpack.c.bf16 %v593_v13, %v592_v14  ;;  %v492_v20 = vadd.f32 %v491_v17, %v171_v47  ;;  %v221_v47 = vpop.permute.xlu0 %220 }
  0xfb   :  { %v595_v22 = vmax.f32 %v497_v16, 0.0 }
  0xfc   :  { %v594_v24 = vmax.f32 %v492_v20, 0.0  ;;  %v2006_v25 = vpop.f32.mrb[16].mxu0  ;;  %2059 = vmatpush1.bf16.msra.mxu0 %v2058_v19  ;;  %2176 = vmatpush1.bf16.msra.mxu1 %v2058_v19 }
  0xfd   :  { %v507_v26 = vadd.f32 %v2006_v25, %v186_v57  ;;  %v501_v27 = vpop.f32.mrb[17].mxu0  ;;  %2060 = vmatprep.subr.bf16.mxu0 %v3351_v23  ;;  %2161 = vmatprep.subr.bf16.mxu1 %v3351_v23  ;;  %v236_v56 = vpop.permute.xlu1 %235 }
  0xfe   :  { %v2061_v28 = vpack.c.bf16 %v595_v22, %v594_v24  ;;  %v502_v29 = vadd.f32 %v501_v27, %v181_v60  ;;  %v231_v59 = vpop.permute.xlu0 %230 }
  0xff   :  { %v597_v30 = vmax.f32 %v507_v26, 0.0 }
 0x100   :  { %v596_v32 = vmax.f32 %v502_v29, 0.0  ;;  %v2009_v33 = vpop.f32.mrb[18].mxu0  ;;  %2062 = vmatpush1.bf16.msra.mxu0 %v2061_v28  ;;  %2177 = vmatpush1.bf16.msra.mxu1 %v2061_v28  ;;  %v612_v29 = vld [vmem:[%s3345_s3] sm:$0xff] }
 0x101   :  { %v517_v35 = vadd.f32 %v2009_v33, %v196_v5  ;;  %v511_v36 = vpop.f32.mrb[19].mxu0  ;;  %2063 = vmatprep.subr.bf16.mxu0 %v3351_v23  ;;  %2162 = vmatprep.subr.bf16.mxu1 %v3351_v23  ;;  %v246_v5 = vpop.permute.xlu1 %245  ;;  %v614_v33 = vld [vmem:[%s3345_s3 + $0x10] sm:$0xff] }
 0x102   :  { %v2064_v37 = vpack.c.bf16 %v597_v30, %v596_v32  ;;  %v512_v38 = vadd.f32 %v511_v36, %v191_v8  ;;  %v241_v8 = vpop.permute.xlu0 %240  ;;  %v664_v30 = vld [vmem:[%s3345_s3 + $0x1a0] sm:$0xff]  ;;  %v667_v32 = vld [vmem:[%s3345_s3 + $0x1b8] sm:$0xff]  ;;  %v669_v36 = vld [vmem:[%s3345_s3 + $0x1c8] sm:$0xff] }
 0x103   :  { %v599_v39 = vmax.f32 %v517_v35, 0.0  ;;  %v617_v35 = vld [vmem:[%s3345_s3 + $0x28] sm:$0xff] }
 0x104   :  { %v598_v40 = vmax.f32 %v512_v38, 0.0  ;;  %v2012_v41 = vpop.f32.mrb[20].mxu0  ;;  %2065 = vmatpush1.bf16.msra.mxu0 %v2064_v37  ;;  %2178 = vmatpush1.bf16.msra.mxu1 %v2064_v37  ;;  %v616_v37 = vld [vmem:[%s3345_s3 + $0x20] sm:$0xff] }
 0x105   :  { %v527_v42 = vadd.f32 %v2012_v41, %v206_v18  ;;  %v521_v43 = vpop.f32.mrb[21].mxu0  ;;  %2066 = vmatprep.subr.bf16.mxu0 %v3351_v23  ;;  %2163 = vmatprep.subr.bf16.mxu1 %v3351_v23  ;;  %v256_v17 = vpop.permute.xlu1 %255  ;;  %v668_v38 = vld [vmem:[%s3345_s3 + $0x1c0] sm:$0xff]  ;;  %v618_v41 = vld [vmem:[%s3345_s3 + $0x30] sm:$0xff] }
 0x106   :  { %v2067_v45 = vpack.c.bf16 %v599_v39, %v598_v40  ;;  %v522_v46 = vadd.f32 %v521_v43, %v201_v21  ;;  %v251_v20 = vpop.permute.xlu0 %250  ;;  %v619_v39 = vld [vmem:[%s3345_s3 + $0x38] sm:$0xff]  ;;  %v621_v43 = vld [vmem:[%s3345_s3 + $0x48] sm:$0xff] }
 0x107   :  { %v601_v48 = vmax.f32 %v527_v42, 0.0  ;;  %v671_v40 = vld [vmem:[%s3345_s3 + $0x1d8] sm:$0xff]  ;;  %v670_v42 = vld [vmem:[%s3345_s3 + $0x1d0] sm:$0xff] }
 0x108   :  { %v600_v49 = vmax.f32 %v522_v46, 0.0  ;;  %v2015_v50 = vpop.f32.mrb[22].mxu0  ;;  %2068 = vmatpush1.bf16.msra.mxu0 %v2067_v45  ;;  %2179 = vmatpush1.bf16.msra.mxu1 %v2067_v45  ;;  %v620_v45 = vld [vmem:[%s3345_s3 + $0x40] sm:$0xff] }
 0x109   :  { %v537_v51 = vadd.f32 %v2015_v50, %v216_v31  ;;  %v531_v52 = vpop.f32.mrb[23].mxu0  ;;  %2069 = vmatprep.subr.bf16.mxu0 %v3351_v23  ;;  %2164 = vmatprep.subr.bf16.mxu1 %v3351_v23  ;;  %v615_v31 = vld [vmem:[%s3345_s3 + $0x18] sm:$0xff]  ;;  %v672_v46 = vld [vmem:[%s3345_s3 + $0x1e0] sm:$0xff]  ;;  %v674_v50 = vld [vmem:[%s3345_s3 + $0x1f0] sm:$0xff] }
 0x10a   :  { %v2070_v53 = vpack.c.bf16 %v601_v48, %v600_v49  ;;  %v532_v54 = vadd.f32 %v531_v52, %v211_v34  ;;  %v666_v34 = vld [vmem:[%s3345_s3 + $0x1b0] sm:$0xff]  ;;  %v675_v48 = vld [vmem:[%s3345_s3 + $0x1f8] sm:$0xff]  ;;  %v677_v52 = vld [vmem:[%s3345_s3 + $0x208] sm:$0xff] }
 0x10b   :  { %v603_v55 = vmax.f32 %v537_v51, 0.0  ;;  %v622_v49 = vld [vmem:[%s3345_s3 + $0x50] sm:$0xff]  ;;  %v625_v51 = vld [vmem:[%s3345_s3 + $0x68] sm:$0xff] }
 0x10c   :  { %v602_v57 = vmax.f32 %v532_v54, 0.0  ;;  %v2018_v58 = vpop.f32.mrb[24].mxu0  ;;  %2071 = vmatpush1.bf16.msra.mxu0 %v2070_v53  ;;  %2180 = vmatpush1.bf16.msra.mxu1 %v2070_v53  ;;  %v624_v53 = vld [vmem:[%s3345_s3 + $0x60] sm:$0xff] }
 0x10d   :  { %v547_v60 = vadd.f32 %v2018_v58, %v226_v44  ;;  %v541_v61 = vpop.f32.mrb[25].mxu0  ;;  %2072 = vmatprep.subr.bf16.mxu0 %v3351_v23  ;;  %2165 = vmatprep.subr.bf16.mxu1 %v3351_v23  ;;  %v673_v44 = vld [vmem:[%s3345_s3 + $0x1e8] sm:$0xff]  ;;  %v676_v54 = vld [vmem:[%s3345_s3 + $0x200] sm:$0xff]  ;;  %v678_v58 = vld [vmem:[%s3345_s3 + $0x210] sm:$0xff] }
 0x10e   :  { %v2073_v62 = vpack.c.bf16 %v603_v55, %v602_v57  ;;  %v542_v63 = vadd.f32 %v541_v61, %v221_v47  ;;  %v623_v47 = vld [vmem:[%s3345_s3 + $0x58] sm:$0xff]  ;;  %v626_v57 = vld [vmem:[%s3345_s3 + $0x70] sm:$0xff]  ;;  %v628_v61 = vld [vmem:[%s3345_s3 + $0x80] sm:$0xff] }
 0x10f   :  { %v605_v0 = vmax.f32 %v547_v60, 0.0  ;;  %v627_v55 = vld [vmem:[%s3345_s3 + $0x78] sm:$0xff]  ;;  %v681_v60 = vld [vmem:[%s3345_s3 + $0x228] sm:$0xff] }
 0x110   :  { %v604_v1 = vmax.f32 %v542_v63, 0.0  ;;  %v2021_v2 = vpop.f32.mrb[26].mxu0  ;;  %2074 = vmatpush1.bf16.msra.mxu0 %v2073_v62  ;;  %2181 = vmatpush1.bf16.msra.mxu1 %v2073_v62  ;;  %v680_v62 = vld [vmem:[%s3345_s3 + $0x220] sm:$0xff]  ;;  %v631_v63 = vld [vmem:[%s3345_s3 + $0x98] sm:$0xff] }
 0x111   :  { %v557_v3 = vadd.f32 %v2021_v2, %v236_v56  ;;  %v551_v4 = vpop.f32.mrb[27].mxu0  ;;  %2075 = vmatprep.subr.bf16.mxu0 %v3351_v23  ;;  %2166 = vmatprep.subr.bf16.mxu1 %v3351_v23  ;;  %v679_v56 = vld [vmem:[%s3345_s3 + $0x218] sm:$0xff]  ;;  %v682_v2 = vld [vmem:[%s3345_s3 + $0x230] sm:$0xff] }
 0x112   :  { %v2076_v6 = vpack.c.bf16 %v605_v0, %v604_v1  ;;  %v552_v7 = vadd.f32 %v551_v4, %v231_v59  ;;  %v629_v59 = vld [vmem:[%s3345_s3 + $0x88] sm:$0xff]  ;;  %v683_v0 = vld [vmem:[%s3345_s3 + $0x238] sm:$0xff]  ;;  %v630_v1 = vld [vmem:[%s3345_s3 + $0x90] sm:$0xff] }
 0x113   :  { %v607_v9 = vmax.f32 %v557_v3, 0.0  ;;  %v633_v3 = vld [vmem:[%s3345_s3 + $0xa8] sm:$0xff] }
 0x114   :  { %v606_v10 = vmax.f32 %v552_v7, 0.0  ;;  %v2024_v11 = vpop.f32.mrb[28].mxu0  ;;  %2077 = vmatpush1.bf16.msra.mxu0 %v2076_v6  ;;  %2182 = vmatpush1.bf16.msra.mxu1 %v2076_v6  ;;  %v685_v4 = vld [vmem:[%s3345_s3 + $0x248] sm:$0xff]  ;;  %v684_v6 = vld [vmem:[%s3345_s3 + $0x240] sm:$0xff]  ;;  %v635_v7 = vld [vmem:[%s3345_s3 + $0xb8] sm:$0xff] }
 0x115   :  { %v567_v12 = vadd.f32 %v2024_v11, %v246_v5  ;;  %v561_v13 = vpop.f32.mrb[29].mxu0  ;;  %2078 = vmatprep.subr.bf16.mxu0 %v3351_v23  ;;  %2167 = vmatprep.subr.bf16.mxu1 %v3351_v23  ;;  %v632_v5 = vld [vmem:[%s3345_s3 + $0xa0] sm:$0xff]  ;;  %v637_v11 = vld [vmem:[%s3345_s3 + $0xc8] sm:$0xff] }
 0x116   :  { %v2079_v14 = vpack.c.bf16 %v607_v9, %v606_v10  ;;  %v562_v15 = vadd.f32 %v561_v13, %v241_v8  ;;  %v687_v8 = vld [vmem:[%s3345_s3 + $0x258] sm:$0xff]  ;;  %v634_v9 = vld [vmem:[%s3345_s3 + $0xb0] sm:$0xff]  ;;  %v636_v13 = vld [vmem:[%s3345_s3 + $0xc0] sm:$0xff] }
 0x117   :  { %v609_v16 = vmax.f32 %v567_v12, 0.0  ;;  %v686_v10 = vld [vmem:[%s3345_s3 + $0x250] sm:$0xff]  ;;  %v689_v12 = vld [vmem:[%s3345_s3 + $0x268] sm:$0xff] }
 0x118   :  { %v608_v18 = vmax.f32 %v562_v15, 0.0  ;;  %v2027_v19 = vpop.f32.mrb[30].mxu0  ;;  %2080 = vmatpush1.bf16.msra.mxu0 %v2079_v14  ;;  %2183 = vmatpush1.bf16.msra.mxu1 %v2079_v14  ;;  %v688_v14 = vld [vmem:[%s3345_s3 + $0x260] sm:$0xff]  ;;  %v639_v15 = vld [vmem:[%s3345_s3 + $0xd8] sm:$0xff] }
 0x119   :  { %v577_v21 = vadd.f32 %v2027_v19, %v256_v17  ;;  %v571_v22 = vpop.f32.mrb[31].mxu0  ;;  %2081 = vmatprep.subr.bf16.mxu0 %v3351_v23  ;;  %2168 = vmatprep.subr.bf16.mxu1 %v3351_v23  ;;  %v638_v17 = vld [vmem:[%s3345_s3 + $0xd0] sm:$0xff]  ;;  %v641_v19 = vld [vmem:[%s3345_s3 + $0xe8] sm:$0xff] }
 0x11a   :  { %v2082_v24 = vpack.c.bf16 %v609_v16, %v608_v18  ;;  %v572_v25 = vadd.f32 %v571_v22, %v251_v20  ;;  %v691_v16 = vld [vmem:[%s3345_s3 + $0x278] sm:$0xff]  ;;  %v690_v18 = vld [vmem:[%s3345_s3 + $0x270] sm:$0xff]  ;;  %v693_v20 = vld [vmem:[%s3345_s3 + $0x288] sm:$0xff] }
 0x11b   :  { %v611_v26 = vmax.f32 %v577_v21, 0.0  ;;  %v640_v21 = vld [vmem:[%s3345_s3 + $0xe0] sm:$0xff] }
 0x11c   :  { %v610_v27 = vmax.f32 %v572_v25, 0.0  ;;  %2083 = vmatpush1.bf16.msra.mxu0 %v2082_v24  ;;  %2184 = vmatpush1.bf16.msra.mxu1 %v2082_v24  ;;  %v692_v22 = vld [vmem:[%s3345_s3 + $0x280] sm:$0xff]  ;;  %v643_v24 = vld [vmem:[%s3345_s3 + $0xf8] sm:$0xff] }
 0x11d   :  { %2084 = vmatprep.subr.bf16.mxu0 %v3351_v23  ;;  %2169 = vmatprep.subr.bf16.mxu1 %v3351_v23  ;;  %v695_v25 = vld [vmem:[%s3345_s3 + $0x298] sm:$0xff] }
 0x11e   :  { %v2085_v28 = vpack.c.bf16 %v611_v26, %v610_v27  ;;  %v642_v26 = vld [vmem:[%s3345_s3 + $0xf0] sm:$0xff] }
 0x11f   :  { %v694_v27 = vld [vmem:[%s3345_s3 + $0x290] sm:$0xff] }
 0x120   :  { %2086 = vmatpush1.bf16.msra.mxu0 %v2085_v28  ;;  %2185 = vmatpush1.bf16.msra.mxu1 %v2085_v28  ;;  %v645_v28 = vld [vmem:[%s3345_s3 + $0x108] sm:$0xff] }
 0x123   :  { %1189 = vmatmul.mubr.f32.vlgmr.msra.gmra.mrb[32].mxu0 %v612_v29  ;;  %1319 = vmatmul.mubr.f32.vlgmr.msra.gmra.mrb[0].mxu1 %v664_v30  ;;  %v697_v29 = vld [vmem:[%s3345_s3 + $0x2a8] sm:$0xff]  ;;  %v644_v30 = vld [vmem:[%s3345_s3 + $0x100] sm:$0xff] }
 0x124   :  { %1193 = vmatprep.mubr.f32.mxu0 %v615_v31  ;;  %1323 = vmatprep.mubr.f32.mxu1 %v667_v32  ;;  %v696_v31 = vld [vmem:[%s3345_s3 + $0x2a0] sm:$0xff]  ;;  %v647_v32 = vld [vmem:[%s3345_s3 + $0x118] sm:$0xff] }
 0x127   :  { %1194 = vmatmul.mubr.f32.gmra.mrb[34].mxu0 %v614_v33  ;;  %1324 = vmatmul.mubr.f32.gmra.mrb[2].mxu1 %v666_v34  ;;  %v699_v33 = vld [vmem:[%s3345_s3 + $0x2b8] sm:$0xff]  ;;  %v646_v34 = vld [vmem:[%s3345_s3 + $0x110] sm:$0xff] }
 0x128   :  { %1198 = vmatprep.mubr.f32.mxu0 %v617_v35  ;;  %1328 = vmatprep.mubr.f32.mxu1 %v669_v36  ;;  %v698_v35 = vld [vmem:[%s3345_s3 + $0x2b0] sm:$0xff]  ;;  %v649_v36 = vld [vmem:[%s3345_s3 + $0x128] sm:$0xff] }
 0x12b   :  { %1199 = vmatmul.mubr.f32.gmra.mrb[36].mxu0 %v616_v37  ;;  %1329 = vmatmul.mubr.f32.gmra.mrb[4].mxu1 %v668_v38  ;;  %v701_v37 = vld [vmem:[%s3345_s3 + $0x2c8] sm:$0xff]  ;;  %v648_v38 = vld [vmem:[%s3345_s3 + $0x120] sm:$0xff] }
 0x12c   :  { %1203 = vmatprep.mubr.f32.mxu0 %v619_v39  ;;  %1333 = vmatprep.mubr.f32.mxu1 %v671_v40  ;;  %v700_v39 = vld [vmem:[%s3345_s3 + $0x2c0] sm:$0xff]  ;;  %v651_v40 = vld [vmem:[%s3345_s3 + $0x138] sm:$0xff] }
 0x12f   :  { %1204 = vmatmul.mubr.f32.gmra.mrb[38].mxu0 %v618_v41  ;;  %1334 = vmatmul.mubr.f32.gmra.mrb[6].mxu1 %v670_v42  ;;  %v703_v41 = vld [vmem:[%s3345_s3 + $0x2d8] sm:$0xff]  ;;  %v650_v42 = vld [vmem:[%s3345_s3 + $0x130] sm:$0xff] }
 0x130   :  { %1208 = vmatprep.mubr.f32.mxu0 %v621_v43  ;;  %1338 = vmatprep.mubr.f32.mxu1 %v673_v44  ;;  %v702_v43 = vld [vmem:[%s3345_s3 + $0x2d0] sm:$0xff]  ;;  %v653_v44 = vld [vmem:[%s3345_s3 + $0x148] sm:$0xff] }
 0x133   :  { %1209 = vmatmul.mubr.f32.gmra.mrb[40].mxu0 %v620_v45  ;;  %1339 = vmatmul.mubr.f32.gmra.mrb[8].mxu1 %v672_v46  ;;  %v705_v45 = vld [vmem:[%s3345_s3 + $0x2e8] sm:$0xff]  ;;  %v652_v46 = vld [vmem:[%s3345_s3 + $0x140] sm:$0xff] }
 0x134   :  { %1213 = vmatprep.mubr.f32.mxu0 %v623_v47  ;;  %1343 = vmatprep.mubr.f32.mxu1 %v675_v48  ;;  %v704_v47 = vld [vmem:[%s3345_s3 + $0x2e0] sm:$0xff]  ;;  %v655_v48 = vld [vmem:[%s3345_s3 + $0x158] sm:$0xff] }
 0x137   :  { %1214 = vmatmul.mubr.f32.gmra.mrb[42].mxu0 %v622_v49  ;;  %1344 = vmatmul.mubr.f32.gmra.mrb[10].mxu1 %v674_v50  ;;  %v707_v49 = vld [vmem:[%s3345_s3 + $0x2f8] sm:$0xff]  ;;  %v654_v50 = vld [vmem:[%s3345_s3 + $0x150] sm:$0xff] }
 0x138   :  { %1218 = vmatprep.mubr.f32.mxu0 %v625_v51  ;;  %1348 = vmatprep.mubr.f32.mxu1 %v677_v52  ;;  %v706_v51 = vld [vmem:[%s3345_s3 + $0x2f0] sm:$0xff]  ;;  %v657_v52 = vld [vmem:[%s3345_s3 + $0x168] sm:$0xff] }
 0x13b   :  { %1219 = vmatmul.mubr.f32.gmra.mrb[44].mxu0 %v624_v53  ;;  %1349 = vmatmul.mubr.f32.gmra.mrb[12].mxu1 %v676_v54  ;;  %v709_v53 = vld [vmem:[%s3345_s3 + $0x308] sm:$0xff]  ;;  %v656_v54 = vld [vmem:[%s3345_s3 + $0x160] sm:$0xff] }
 0x13c   :  { %1223 = vmatprep.mubr.f32.mxu0 %v627_v55  ;;  %1353 = vmatprep.mubr.f32.mxu1 %v679_v56  ;;  %v708_v55 = vld [vmem:[%s3345_s3 + $0x300] sm:$0xff]  ;;  %v659_v56 = vld [vmem:[%s3345_s3 + $0x178] sm:$0xff] }
 0x13f   :  { %1224 = vmatmul.mubr.f32.gmra.mrb[46].mxu0 %v626_v57  ;;  %1354 = vmatmul.mubr.f32.gmra.mrb[14].mxu1 %v678_v58  ;;  %v711_v57 = vld [vmem:[%s3345_s3 + $0x318] sm:$0xff]  ;;  %v2991_v58 = vpop.permute.xlu1 %891 }
 0x140   :  { %1228 = vmatprep.mubr.f32.mxu0 %v629_v59  ;;  %1358 = vmatprep.mubr.f32.mxu1 %v681_v60  ;;  %v2993_v59 = vpop.permute.xlu0 %886  ;;  %v658_v60 = vld [vmem:[%s3345_s3 + $0x170] sm:$0xff] }
 0x143   :  { %1229 = vmatmul.mubr.f32.gmra.mrb[48].mxu0 %v628_v61  ;;  %1359 = vmatmul.mubr.f32.gmra.mrb[16].mxu1 %v680_v62  ;;  %v710_v61 = vld [vmem:[%s3345_s3 + $0x310] sm:$0xff]  ;;  %v661_v62 = vld [vmem:[%s3345_s3 + $0x188] sm:$0xff] }
 0x144   :  { %1233 = vmatprep.mubr.f32.mxu0 %v631_v63  ;;  %1363 = vmatprep.mubr.f32.mxu1 %v683_v0  ;;  %v713_v63 = vld [vmem:[%s3345_s3 + $0x328] sm:$0xff]  ;;  %v660_v0 = vld [vmem:[%s3345_s3 + $0x180] sm:$0xff] }
 0x147   :  { %1234 = vmatmul.mubr.f32.gmra.mrb[50].mxu0 %v630_v1  ;;  %1364 = vmatmul.mubr.f32.gmra.mrb[18].mxu1 %v682_v2  ;;  %v712_v1 = vld [vmem:[%s3345_s3 + $0x320] sm:$0xff]  ;;  %v3013_v2 = vpop.permute.xlu1 %811 }
 0x148   :  { %1238 = vmatprep.mubr.f32.mxu0 %v633_v3  ;;  %1368 = vmatprep.mubr.f32.mxu1 %v685_v4  ;;  %v3015_v3 = vpop.permute.xlu0 %806  ;;  %v663_v4 = vld [vmem:[%s3345_s3 + $0x198] sm:$0xff] }
 0x14b   :  { %1239 = vmatmul.mubr.f32.gmra.mrb[52].mxu0 %v632_v5  ;;  %1369 = vmatmul.mubr.f32.gmra.mrb[20].mxu1 %v684_v6  ;;  %v715_v5 = vld [vmem:[%s3345_s3 + $0x338] sm:$0xff]  ;;  %v662_v6 = vld [vmem:[%s3345_s3 + $0x190] sm:$0xff] }
 0x14c   :  { %1243 = vmatprep.mubr.f32.mxu0 %v635_v7  ;;  %1373 = vmatprep.mubr.f32.mxu1 %v687_v8  ;;  %v714_v7 = vld [vmem:[%s3345_s3 + $0x330] sm:$0xff]  ;;  %v717_v8 = vld [vmem:[%s3345_s3 + $0x348] sm:$0xff] }
 0x14f   :  { %1244 = vmatmul.mubr.f32.gmra.mrb[54].mxu0 %v634_v9  ;;  %1374 = vmatmul.mubr.f32.gmra.mrb[22].mxu1 %v686_v10  ;;  %v3032_v9 = vpop.permute.xlu1 %901  ;;  %v3034_v10 = vpop.permute.xlu0 %896 }
 0x150   :  { %1248 = vmatprep.mubr.f32.mxu0 %v637_v11  ;;  %1378 = vmatprep.mubr.f32.mxu1 %v689_v12  ;;  %v716_v11 = vld [vmem:[%s3345_s3 + $0x340] sm:$0xff]  ;;  %v719_v12 = vld [vmem:[%s3345_s3 + $0x358] sm:$0xff] }
 0x153   :  { %1249 = vmatmul.mubr.f32.gmra.mrb[56].mxu0 %v636_v13  ;;  %1379 = vmatmul.mubr.f32.gmra.mrb[24].mxu1 %v688_v14  ;;  %v718_v13 = vld [vmem:[%s3345_s3 + $0x350] sm:$0xff]  ;;  %v3045_v14 = vpop.permute.xlu1 %821 }
 0x154   :  { %1253 = vmatprep.mubr.f32.mxu0 %v639_v15  ;;  %1383 = vmatprep.mubr.f32.mxu1 %v691_v16  ;;  %v3047_v15 = vpop.permute.xlu0 %816  ;;  %v721_v16 = vld [vmem:[%s3345_s3 + $0x368] sm:$0xff] }
 0x157   :  { %1254 = vmatmul.mubr.f32.gmra.mrb[58].mxu0 %v638_v17  ;;  %1384 = vmatmul.mubr.f32.gmra.mrb[26].mxu1 %v690_v18  ;;  %v720_v17 = vld [vmem:[%s3345_s3 + $0x360] sm:$0xff]  ;;  %v723_v18 = vld [vmem:[%s3345_s3 + $0x378] sm:$0xff] }
 0x158   :  { %1258 = vmatprep.mubr.f32.mxu0 %v641_v19  ;;  %1388 = vmatprep.mubr.f32.mxu1 %v693_v20  ;;  %v3058_v19 = vpop.permute.xlu1 %911  ;;  %v3060_v20 = vpop.permute.xlu0 %906 }
 0x15b   :  { %1259 = vmatmul.mubr.f32.gmra.mrb[60].mxu0 %v640_v21  ;;  %1389 = vmatmul.mubr.f32.gmra.mrb[28].mxu1 %v692_v22  ;;  %v722_v21 = vld [vmem:[%s3345_s3 + $0x370] sm:$0xff]  ;;  %v725_v22 = vld [vmem:[%s3345_s3 + $0x388] sm:$0xff] }
 0x15c   :  { %1263 = vmatprep.mubr.f32.mxu0 %v643_v24  ;;  %1393 = vmatprep.mubr.f32.mxu1 %v695_v25  ;;  %v724_v24 = vld [vmem:[%s3345_s3 + $0x380] sm:$0xff]  ;;  %v3071_v25 = vpop.permute.xlu1 %831 }
 0x15f   :  { %1264 = vmatmul.mubr.f32.gmra.mrb[62].mxu0 %v642_v26  ;;  %1394 = vmatmul.mubr.f32.gmra.mrb[30].mxu1 %v694_v27  ;;  %v3073_v26 = vpop.permute.xlu0 %826  ;;  %v727_v27 = vld [vmem:[%s3345_s3 + $0x398] sm:$0xff] }
 0x160   :  { %1268 = vmatprep.mubr.f32.mxu0 %v645_v28  ;;  %1398 = vmatprep.mubr.f32.mxu1 %v697_v29  ;;  %v726_v28 = vld [vmem:[%s3345_s3 + $0x390] sm:$0xff]  ;;  %v729_v29 = vld [vmem:[%s3345_s3 + $0x3a8] sm:$0xff] }
 0x163   :  { %1269 = vmatmul.mubr.f32.gmra.mrb[64].mxu0 %v644_v30  ;;  %1399 = vmatmul.mubr.f32.gmra.mrb[32].mxu1 %v696_v31  ;;  %v3084_v30 = vpop.permute.xlu1 %921  ;;  %v3086_v31 = vpop.permute.xlu0 %916 }
 0x164   :  { %1273 = vmatprep.mubr.f32.mxu0 %v647_v32  ;;  %1403 = vmatprep.mubr.f32.mxu1 %v699_v33  ;;  %v728_v32 = vld [vmem:[%s3345_s3 + $0x3a0] sm:$0xff]  ;;  %v731_v33 = vld [vmem:[%s3345_s3 + $0x3b8] sm:$0xff] }
 0x167   :  { %1274 = vmatmul.mubr.f32.gmra.mrb[66].mxu0 %v646_v34  ;;  %1404 = vmatmul.mubr.f32.gmra.mrb[34].mxu1 %v698_v35  ;;  %v730_v34 = vld [vmem:[%s3345_s3 + $0x3b0] sm:$0xff]  ;;  %v3097_v35 = vpop.permute.xlu1 %841 }
 0x168   :  { %1278 = vmatprep.mubr.f32.mxu0 %v649_v36  ;;  %1408 = vmatprep.mubr.f32.mxu1 %v701_v37  ;;  %v3099_v36 = vpop.permute.xlu0 %836  ;;  %v733_v37 = vld [vmem:[%s3345_s3 + $0x3c8] sm:$0xff] }
 0x16b   :  { %1279 = vmatmul.mubr.f32.gmra.mrb[68].mxu0 %v648_v38  ;;  %1409 = vmatmul.mubr.f32.gmra.mrb[36].mxu1 %v700_v39  ;;  %v732_v38 = vld [vmem:[%s3345_s3 + $0x3c0] sm:$0xff]  ;;  %v735_v39 = vld [vmem:[%s3345_s3 + $0x3d8] sm:$0xff] }
 0x16c   :  { %1283 = vmatprep.mubr.f32.mxu0 %v651_v40  ;;  %1413 = vmatprep.mubr.f32.mxu1 %v703_v41  ;;  %v3110_v40 = vpop.permute.xlu1 %931  ;;  %v3112_v41 = vpop.permute.xlu0 %926 }
 0x16f   :  { %1284 = vmatmul.mubr.f32.gmra.mrb[70].mxu0 %v650_v42  ;;  %1414 = vmatmul.mubr.f32.gmra.mrb[38].mxu1 %v702_v43  ;;  %v734_v42 = vld [vmem:[%s3345_s3 + $0x3d0] sm:$0xff]  ;;  %v737_v43 = vld [vmem:[%s3345_s3 + $0x3e8] sm:$0xff] }
 0x170   :  { %1288 = vmatprep.mubr.f32.mxu0 %v653_v44  ;;  %1418 = vmatprep.mubr.f32.mxu1 %v705_v45  ;;  %v736_v44 = vld [vmem:[%s3345_s3 + $0x3e0] sm:$0xff]  ;;  %v3123_v45 = vpop.permute.xlu1 %851 }
 0x173   :  { %1289 = vmatmul.mubr.f32.gmra.mrb[72].mxu0 %v652_v46  ;;  %1419 = vmatmul.mubr.f32.gmra.mrb[40].mxu1 %v704_v47  ;;  %v3125_v46 = vpop.permute.xlu0 %846  ;;  %v739_v47 = vld [vmem:[%s3345_s3 + $0x3f8] sm:$0xff] }
 0x174   :  { %1293 = vmatprep.mubr.f32.mxu0 %v655_v48  ;;  %1423 = vmatprep.mubr.f32.mxu1 %v707_v49  ;;  %v738_v48 = vld [vmem:[%s3345_s3 + $0x3f0] sm:$0xff]  ;;  %v942_v49 = vpop.permute.xlu1 %941 }
 0x177   :  { %1294 = vmatmul.mubr.f32.gmra.mrb[74].mxu0 %v654_v50  ;;  %1424 = vmatmul.mubr.f32.gmra.mrb[42].mxu1 %v706_v51  ;;  %v937_v50 = vpop.permute.xlu0 %936 }
 0x178   :  { %1298 = vmatprep.mubr.f32.mxu0 %v657_v52  ;;  %1428 = vmatprep.mubr.f32.mxu1 %v709_v53  ;;  %v3133_v51 = vpop.permute.xlu1 %861 }
 0x17b   :  { %1299 = vmatmul.mubr.f32.gmra.mrb[76].mxu0 %v656_v54  ;;  %1429 = vmatmul.mubr.f32.gmra.mrb[44].mxu1 %v708_v55  ;;  %v3135_v52 = vpop.permute.xlu0 %856 }
 0x17c   :  { %1303 = vmatprep.mubr.f32.mxu0 %v659_v56  ;;  %1433 = vmatprep.mubr.f32.mxu1 %v711_v57  ;;  %v952_v53 = vpop.permute.xlu1 %951 }
 0x17f   :  { %1304 = vmatmul.mubr.f32.gmra.mrb[78].mxu0 %v658_v60  ;;  %1434 = vmatmul.mubr.f32.gmra.mrb[46].mxu1 %v710_v61  ;;  %v947_v54 = vpop.permute.xlu0 %946 }
 0x180   :  { %1308 = vmatprep.mubr.f32.mxu0 %v661_v62  ;;  %1438 = vmatprep.mubr.f32.mxu1 %v713_v63  ;;  %v3137_v55 = vpop.permute.xlu1 %871 }
 0x183   :  { %1309 = vmatmul.mubr.f32.gmra.mrb[80].mxu0 %v660_v0  ;;  %1439 = vmatmul.mubr.f32.gmra.mrb[48].mxu1 %v712_v1  ;;  %v3139_v56 = vpop.permute.xlu0 %866 }
 0x184   :  { %1313 = vmatprep.mubr.f32.mxu0 %v663_v4  ;;  %1443 = vmatprep.mubr.f32.mxu1 %v715_v5  ;;  %v3141_v57 = vpop.permute.xlu1 %961 }
 0x187   :  { %1314 = vmatmul.mubr.f32.gmra.mrb[82].mxu0 %v662_v6  ;;  %1444 = vmatmul.mubr.f32.gmra.mrb[50].mxu1 %v714_v7  ;;  %v3143_v60 = vpop.permute.xlu0 %956 }
 0x188   :  { %1448 = vmatprep.mubr.f32.mxu1 %v717_v8  ;;  %v3145_v61 = vpop.permute.xlu1 %881 }
 0x18b   :  { %1449 = vmatmul.mubr.f32.gmra.mrb[52].mxu1 %v716_v11  ;;  %v3147_v62 = vpop.permute.xlu0 %876  ;;  %v1574_v11 = vld [vmem:[%s3348_s5 + $0x8] sm:$0xff] }
 0x18c   :  { %1453 = vmatprep.mubr.f32.mxu1 %v719_v12  ;;  %v3149_v63 = vpop.permute.xlu1 %1051  ;;  %1657 = vmatprep.mubr.f32.mxu0 %v1574_v11 }
 0x18f   :  { %1454 = vmatmul.mubr.f32.gmra.mrb[54].mxu1 %v718_v13  ;;  %v3151_v0 = vpop.permute.xlu0 %1046 }
 0x190   :  { %1458 = vmatprep.mubr.f32.mxu1 %v721_v16  ;;  %v3153_v1 = vpop.permute.xlu1 %971 }
 0x193   :  { %1459 = vmatmul.mubr.f32.gmra.mrb[56].mxu1 %v720_v17  ;;  %v3155_v4 = vpop.permute.xlu0 %966 }
 0x194   :  { %1463 = vmatprep.mubr.f32.mxu1 %v723_v18  ;;  %v3157_v5 = vpop.permute.xlu1 %1061 }
 0x197   :  { %1464 = vmatmul.mubr.f32.gmra.mrb[58].mxu1 %v722_v21  ;;  %v3159_v6 = vpop.permute.xlu0 %1056 }
 0x198   :  { %1468 = vmatprep.mubr.f32.mxu1 %v725_v22  ;;  %v3161_v7 = vpop.permute.xlu1 %981 }
 0x19b   :  { %1469 = vmatmul.mubr.f32.gmra.mrb[60].mxu1 %v724_v24  ;;  %v3163_v8 = vpop.permute.xlu0 %976 }
 0x19c   :  { %1473 = vmatprep.mubr.f32.mxu1 %v727_v27  ;;  %v3168_v12 = vpop.permute.xlu1 %1071 }
 0x19f   :  { %1474 = vmatmul.mubr.f32.gmra.mrb[62].mxu1 %v726_v28  ;;  %v3170_v13 = vpop.permute.xlu0 %1066 }
 0x1a0   :  { %1478 = vmatprep.mubr.f32.mxu1 %v729_v29  ;;  %v3172_v22 = vpop.permute.xlu1 %991 }
 0x1a3   :  { %1479 = vmatmul.mubr.f32.gmra.mrb[64].mxu1 %v728_v32  ;;  %v3174_v24 = vpop.permute.xlu0 %986 }
 0x1a4   :  { %1483 = vmatprep.mubr.f32.mxu1 %v731_v33 }
 0x1a7   :  { %1484 = vmatmul.mubr.f32.gmra.mrb[66].mxu1 %v730_v34 }
 0x1a8   :  { %1488 = vmatprep.mubr.f32.mxu1 %v733_v37 }
 0x1ab   :  { %1489 = vmatmul.mubr.f32.gmra.mrb[68].mxu1 %v732_v38 }
 0x1ac   :  { %1493 = vmatprep.mubr.f32.mxu1 %v735_v39 }
 0x1af   :  { %1494 = vmatmul.mubr.f32.gmra.mrb[70].mxu1 %v734_v42 }
 0x1b0   :  { %1498 = vmatprep.mubr.f32.mxu1 %v737_v43 }
 0x1b3   :  { %1499 = vmatmul.mubr.f32.gmra.mrb[72].mxu1 %v736_v44 }
 0x1b4   :  { %1503 = vmatprep.mubr.f32.mxu1 %v739_v47 }
 0x1b7   :  { %1504 = vmatmul.mubr.f32.gmra.mrb[74].mxu1 %v738_v48 }
 0x1f6   :  { %v1190_v16 = vpop.f32.mrb[32].mxu0  ;;  %v1320_v17 = vpop.f32.mrb[0].mxu1 }
 0x1f7   :  { %v1192_v18 = vpop.f32.mrb[33].mxu0  ;;  %v1322_v21 = vpop.f32.mrb[1].mxu1  ;;  %v1191_v27 = vadd.f32 %v1190_v16, %v3015_v3  ;;  %v1321_v28 = vadd.f32 %v1320_v17, %v937_v50 }
 0x1f8   :  { %v3182_v50 = vpop.permute.xlu1 %1081  ;;  %v3184_v16 = vpop.permute.xlu0 %1076 }
 0x1f9   :  { %v1509_v39 = vmax.f32 %v1191_v27, 0.0  ;;  %v1535_v42 = vmax.f32 %v1321_v28, 0.0 }
 0x1fa   :  { %v1195_v29 = vpop.f32.mrb[34].mxu0  ;;  %v1325_v32 = vpop.f32.mrb[2].mxu1 }
 0x1fb   :  { %v1196_v33 = vadd.f32 %v1195_v29, %v3013_v2  ;;  %v1326_v34 = vadd.f32 %v1325_v32, %v942_v49  ;;  %v1197_v37 = vpop.f32.mrb[35].mxu0  ;;  %v1327_v38 = vpop.f32.mrb[3].mxu1 }
 0x1fd   :  { %v1510_v43 = vmax.f32 %v1196_v33, 0.0  ;;  %v1536_v44 = vmax.f32 %v1326_v34, 0.0 }
 0x1fe   :  { %v1200_v47 = vpop.f32.mrb[36].mxu0  ;;  %v1330_v48 = vpop.f32.mrb[4].mxu1 }
 0x1ff   :  { %v3178_v11 = vpack.c.bf16 %v1510_v43, %v1509_v39  ;;  %v3180_v18 = vpack.c.bf16 %v1536_v44, %v1535_v42  ;;  %v1202_v21 = vpop.f32.mrb[37].mxu0  ;;  %v1332_v3 = vpop.f32.mrb[5].mxu1  ;;  %v1201_v2 = vadd.f32 %v1200_v47, %v3047_v15  ;;  %v1331_v49 = vadd.f32 %v1330_v48, %v947_v54 }
 0x200   :  { %v3192_v54 = vpop.permute.xlu1 %1001  ;;  %v3194_v47 = vpop.permute.xlu0 %996 }
 0x201   :  { %v1511_v34 = vmax.f32 %v1201_v2, 0.0  ;;  %v1537_v37 = vmax.f32 %v1331_v49, 0.0 }
 0x202   :  { %v1205_v17 = vpop.f32.mrb[38].mxu0  ;;  %v1335_v27 = vpop.f32.mrb[6].mxu1 }
 0x203   :  { %v1206_v28 = vadd.f32 %v1205_v17, %v3045_v14  ;;  %v1336_v29 = vadd.f32 %v1335_v27, %v952_v53  ;;  %v1207_v32 = vpop.f32.mrb[39].mxu0  ;;  %v1337_v33 = vpop.f32.mrb[7].mxu1 }
 0x205   :  { %v1512_v38 = vmax.f32 %v1206_v28, 0.0  ;;  %v1538_v39 = vmax.f32 %v1336_v29, 0.0 }
 0x206   :  { %v1210_v42 = vpop.f32.mrb[40].mxu0  ;;  %v1340_v43 = vpop.f32.mrb[8].mxu1 }
 0x207   :  { %v3188_v44 = vpack.c.bf16 %v1512_v38, %v1511_v34  ;;  %v3190_v21 = vpack.c.bf16 %v1538_v39, %v1537_v37  ;;  %v1212_v3 = vpop.f32.mrb[41].mxu0  ;;  %v1342_v15 = vpop.f32.mrb[9].mxu1  ;;  %v1211_v14 = vadd.f32 %v1210_v42, %v3073_v26  ;;  %v1341_v53 = vadd.f32 %v1340_v43, %v3143_v60 }
 0x208   :  { %v3204_v42 = vpop.permute.xlu1 %1091  ;;  %v3206_v43 = vpop.permute.xlu0 %1086 }
 0x209   :  { %v1513_v29 = vmax.f32 %v1211_v14, 0.0  ;;  %v1539_v32 = vmax.f32 %v1341_v53, 0.0 }
 0x20a   :  { %v1215_v48 = vpop.f32.mrb[42].mxu0  ;;  %v1345_v2 = vpop.f32.mrb[10].mxu1 }
 0x20b   :  { %v1216_v49 = vadd.f32 %v1215_v48, %v3071_v25  ;;  %v1346_v17 = vadd.f32 %v1345_v2, %v3141_v57  ;;  %v1217_v27 = vpop.f32.mrb[43].mxu0  ;;  %v1347_v28 = vpop.f32.mrb[11].mxu1 }
 0x20d   :  { %v1514_v33 = vmax.f32 %v1216_v49, 0.0  ;;  %v1540_v34 = vmax.f32 %v1346_v17, 0.0 }
 0x20e   :  { %v1220_v37 = vpop.f32.mrb[44].mxu0  ;;  %v1350_v38 = vpop.f32.mrb[12].mxu1 }
 0x20f   :  { %v3200_v39 = vpack.c.bf16 %v1514_v33, %v1513_v29  ;;  %v3202_v3 = vpack.c.bf16 %v1540_v34, %v1539_v32  ;;  %v1222_v26 = vpop.f32.mrb[45].mxu0  ;;  %v1352_v60 = vpop.f32.mrb[13].mxu1  ;;  %v1221_v25 = vadd.f32 %v1220_v37, %v3099_v36  ;;  %v1351_v57 = vadd.f32 %v1350_v38, %v3155_v4 }
 0x210   :  { %v3216_v37 = vpop.permute.xlu1 %1011  ;;  %v1007_v38 = vpop.permute.xlu0 %1006 }
 0x211   :  { %v1515_v17 = vmax.f32 %v1221_v25, 0.0  ;;  %v1541_v27 = vmax.f32 %v1351_v57, 0.0 }
 0x212   :  { %v1225_v15 = vpop.f32.mrb[46].mxu0  ;;  %v1355_v14 = vpop.f32.mrb[14].mxu1 }
 0x213   :  { %v1226_v53 = vadd.f32 %v1225_v15, %v3097_v35  ;;  %v1356_v48 = vadd.f32 %v1355_v14, %v3153_v1  ;;  %v1227_v2 = vpop.f32.mrb[47].mxu0  ;;  %v1357_v49 = vpop.f32.mrb[15].mxu1 }
 0x215   :  { %v1516_v28 = vmax.f32 %v1226_v53, 0.0  ;;  %v1542_v29 = vmax.f32 %v1356_v48, 0.0 }
 0x216   :  { %v1230_v32 = vpop.f32.mrb[48].mxu0  ;;  %v1360_v33 = vpop.f32.mrb[16].mxu1 }
 0x217   :  { %v3212_v34 = vpack.c.bf16 %v1516_v28, %v1515_v17  ;;  %v3214_v26 = vpack.c.bf16 %v1542_v29, %v1541_v27  ;;  %v1232_v36 = vpop.f32.mrb[49].mxu0  ;;  %v1362_v4 = vpop.f32.mrb[17].mxu1  ;;  %v1231_v35 = vadd.f32 %v1230_v32, %v3125_v46  ;;  %v1361_v1 = vadd.f32 %v1360_v33, %v3163_v8 }
 0x218   :  { %v3226_v32 = vpop.permute.xlu1 %1101  ;;  %v3228_v33 = vpop.permute.xlu0 %1096 }
 0x219   :  { %v1517_v48 = vmax.f32 %v1231_v35, 0.0  ;;  %v1543_v2 = vmax.f32 %v1361_v1, 0.0 }
 0x21a   :  { %v1235_v60 = vpop.f32.mrb[50].mxu0  ;;  %v1365_v25 = vpop.f32.mrb[18].mxu1 }
 0x21b   :  { %v1236_v57 = vadd.f32 %v1235_v60, %v3123_v45  ;;  %v1366_v15 = vadd.f32 %v1365_v25, %v3161_v7  ;;  %v1237_v14 = vpop.f32.mrb[51].mxu0  ;;  %v1367_v53 = vpop.f32.mrb[19].mxu1 }
 0x21d   :  { %v1518_v49 = vmax.f32 %v1236_v57, 0.0  ;;  %v1544_v17 = vmax.f32 %v1366_v15, 0.0 }
 0x21e   :  { %v1240_v27 = vpop.f32.mrb[52].mxu0  ;;  %v1370_v28 = vpop.f32.mrb[20].mxu1 }
 0x21f   :  { %v3222_v29 = vpack.c.bf16 %v1518_v49, %v1517_v48  ;;  %v3224_v36 = vpack.c.bf16 %v1544_v17, %v1543_v2  ;;  %v1242_v46 = vpop.f32.mrb[53].mxu0  ;;  %v1372_v8 = vpop.f32.mrb[21].mxu1  ;;  %v1241_v45 = vadd.f32 %v1240_v27, %v3135_v52  ;;  %v1371_v7 = vadd.f32 %v1370_v28, %v3174_v24 }
 0x220   :  { %v1022_v27 = vpop.permute.xlu1 %1021  ;;  %v1017_v28 = vpop.permute.xlu0 %1016 }
 0x221   :  { %v1519_v15 = vmax.f32 %v1241_v45, 0.0  ;;  %v1545_v14 = vmax.f32 %v1371_v7, 0.0 }
 0x222   :  { %v1245_v4 = vpop.f32.mrb[54].mxu0  ;;  %v1375_v35 = vpop.f32.mrb[22].mxu1 }
 0x223   :  { %v1246_v1 = vadd.f32 %v1245_v4, %v3133_v51  ;;  %v1376_v60 = vadd.f32 %v1375_v35, %v3172_v22  ;;  %v1247_v25 = vpop.f32.mrb[55].mxu0  ;;  %v1377_v57 = vpop.f32.mrb[23].mxu1 }
 0x225   :  { %v1520_v53 = vmax.f32 %v1246_v1, 0.0  ;;  %v1546_v48 = vmax.f32 %v1376_v60, 0.0 }
 0x226   :  { %v1250_v2 = vpop.f32.mrb[56].mxu0  ;;  %v1380_v49 = vpop.f32.mrb[24].mxu1 }
 0x227   :  { %v3234_v17 = vpack.c.bf16 %v1520_v53, %v1519_v15  ;;  %v3236_v46 = vpack.c.bf16 %v1546_v48, %v1545_v14  ;;  %v1252_v52 = vpop.f32.mrb[57].mxu0  ;;  %v1382_v24 = vpop.f32.mrb[25].mxu1  ;;  %v1251_v51 = vadd.f32 %v1250_v2, %v3139_v56  ;;  %v1381_v22 = vadd.f32 %v1380_v49, %v3194_v47 }
 0x228   :  { %v3246_v2 = vpop.permute.xlu1 %1111  ;;  %v3248_v49 = vpop.permute.xlu0 %1106 }
 0x229   :  { %v1521_v60 = vmax.f32 %v1251_v51, 0.0  ;;  %v1547_v25 = vmax.f32 %v1381_v22, 0.0 }
 0x22a   :  { %v1255_v8 = vpop.f32.mrb[58].mxu0  ;;  %v1385_v4 = vpop.f32.mrb[26].mxu1 }
 0x22b   :  { %v1256_v45 = vadd.f32 %v1255_v8, %v3137_v55  ;;  %v1386_v7 = vadd.f32 %v1385_v4, %v3192_v54  ;;  %v1257_v35 = vpop.f32.mrb[59].mxu0  ;;  %v1387_v1 = vpop.f32.mrb[27].mxu1 }
 0x22d   :  { %v1522_v57 = vmax.f32 %v1256_v45, 0.0  ;;  %v1548_v15 = vmax.f32 %v1386_v7, 0.0 }
 0x22e   :  { %v1260_v14 = vpop.f32.mrb[60].mxu0  ;;  %v1390_v53 = vpop.f32.mrb[28].mxu1 }
 0x22f   :  { %v3242_v48 = vpack.c.bf16 %v1522_v57, %v1521_v60  ;;  %v3244_v52 = vpack.c.bf16 %v1548_v15, %v1547_v25  ;;  %v1262_v56 = vpop.f32.mrb[61].mxu0  ;;  %v1392_v47 = vpop.f32.mrb[29].mxu1  ;;  %v1261_v55 = vadd.f32 %v1260_v14, %v3147_v62  ;;  %v1391_v54 = vadd.f32 %v1390_v53, %v1007_v38 }
 0x230   :  { %v1032_v14 = vpop.permute.xlu1 %1031  ;;  %v1027_v53 = vpop.permute.xlu0 %1026 }
 0x231   :  { %v1523_v7 = vmax.f32 %v1261_v55, 0.0  ;;  %v1549_v35 = vmax.f32 %v1391_v54, 0.0 }
 0x232   :  { %v1265_v24 = vpop.f32.mrb[62].mxu0  ;;  %v1395_v51 = vpop.f32.mrb[30].mxu1 }
 0x233   :  { %v1266_v22 = vadd.f32 %v1265_v24, %v3145_v61  ;;  %v1396_v8 = vadd.f32 %v1395_v51, %v3216_v37  ;;  %v1267_v4 = vpop.f32.mrb[63].mxu0  ;;  %v1397_v45 = vpop.f32.mrb[31].mxu1 }
 0x235   :  { %v1524_v1 = vmax.f32 %v1266_v22, 0.0  ;;  %v1550_v60 = vmax.f32 %v1396_v8, 0.0 }
 0x236   :  { %v1270_v25 = vpop.f32.mrb[64].mxu0  ;;  %v1400_v57 = vpop.f32.mrb[32].mxu1 }
 0x237   :  { %v3253_v15 = vpack.c.bf16 %v1524_v1, %v1523_v7  ;;  %v3255_v56 = vpack.c.bf16 %v1550_v60, %v1549_v35  ;;  %v1272_v62 = vpop.f32.mrb[65].mxu0  ;;  %v1402_v38 = vpop.f32.mrb[33].mxu1  ;;  %v1271_v61 = vadd.f32 %v1270_v25, %v2993_v59  ;;  %v1401_v47 = vadd.f32 %v1400_v57, %v1017_v28 }
 0x238   :  { %v3261_v59 = vpop.permute.xlu1 %1121  ;;  %v3263_v28 = vpop.permute.xlu0 %1116 }
 0x239   :  { %v1525_v8 = vmax.f32 %v1271_v61, 0.0  ;;  %v1551_v4 = vmax.f32 %v1401_v47, 0.0 }
 0x23a   :  { %v1275_v37 = vpop.f32.mrb[66].mxu0  ;;  %v1405_v24 = vpop.f32.mrb[34].mxu1 }
 0x23b   :  { %v1276_v55 = vadd.f32 %v1275_v37, %v2991_v58  ;;  %v1406_v54 = vadd.f32 %v1405_v24, %v1022_v27  ;;  %v1277_v51 = vpop.f32.mrb[67].mxu0  ;;  %v1407_v22 = vpop.f32.mrb[35].mxu1 }
 0x23d   :  { %v1526_v45 = vmax.f32 %v1276_v55, 0.0  ;;  %v1552_v7 = vmax.f32 %v1406_v54, 0.0 }
 0x23e   :  { %v1280_v35 = vpop.f32.mrb[68].mxu0  ;;  %v1410_v1 = vpop.f32.mrb[36].mxu1 }
 0x23f   :  { %v2087_v60 = vpack.c.bf16 %v1526_v45, %v1525_v8  ;;  %v3259_v62 = vpack.c.bf16 %v1552_v7, %v1551_v4  ;;  %v1282_v38 = vpop.f32.mrb[69].mxu0  ;;  %v1412_v23 = vpop.f32.mrb[37].mxu1  ;;  %v1281_v58 = vadd.f32 %v1280_v35, %v3034_v10  ;;  %v1411_v27 = vadd.f32 %v1410_v1, %v1027_v53 }
 0x240   :  { %v1037_v7 = vpop.permute.xlu0 %1036  ;;  %v1042_v35 = vpop.permute.xlu1 %1041 }
 0x241   :  { %2088 = vmatprep.subr.bf16.mxu0 %v2087_v60  ;;  %v1527_v55 = vmax.f32 %v1281_v58, 0.0  ;;  %v1553_v54 = vmax.f32 %v1411_v27, 0.0 }
 0x242   :  { %v1285_v25 = vpop.f32.mrb[70].mxu0  ;;  %v1415_v57 = vpop.f32.mrb[38].mxu1  ;;  %2090 = vmatpush3.bf16.msra.mxu0 %v3178_v11 }
 0x243   :  { %v1286_v61 = vadd.f32 %v1285_v25, %v3032_v9  ;;  %v1416_v47 = vadd.f32 %v1415_v57, %v1032_v14  ;;  %v1287_v37 = vpop.f32.mrb[71].mxu0  ;;  %v1417_v24 = vpop.f32.mrb[39].mxu1 }
 0x245   :  { %v1528_v23 = vmax.f32 %v1286_v61, 0.0  ;;  %v1554_v51 = vmax.f32 %v1416_v47, 0.0 }
 0x246   :  { %v1290_v22 = vpop.f32.mrb[72].mxu0  ;;  %v1420_v8 = vpop.f32.mrb[40].mxu1 }
 0x247   :  { %v2091_v4 = vpack.c.bf16 %v1528_v23, %v1527_v55  ;;  %v3268_v45 = vpack.c.bf16 %v1554_v51, %v1553_v54  ;;  %v1292_v10 = vpop.f32.mrb[73].mxu0  ;;  %v1422_v53 = vpop.f32.mrb[41].mxu1  ;;  %v1291_v11 = vadd.f32 %v1290_v22, %v3060_v20  ;;  %v1421_v1 = vadd.f32 %v1420_v8, %v1037_v7 }
 0x249   :  { %2092 = vmatprep.subr.bf16.mxu0 %v2091_v4  ;;  %v1529_v25 = vmax.f32 %v1291_v11, 0.0  ;;  %v1555_v57 = vmax.f32 %v1421_v1, 0.0 }
 0x24a   :  { %v1295_v9 = vpop.f32.mrb[74].mxu0  ;;  %v1425_v14 = vpop.f32.mrb[42].mxu1  ;;  %2094 = vmatpush3.bf16.msra.mxu0 %v3188_v44 }
 0x24b   :  { %v1296_v60 = vadd.f32 %v1295_v9, %v3058_v19  ;;  %v1426_v38 = vadd.f32 %v1425_v14, %v1042_v35  ;;  %v1297_v58 = vpop.f32.mrb[75].mxu0  ;;  %v1427_v27 = vpop.f32.mrb[43].mxu1 }
 0x24d   :  { %v1530_v61 = vmax.f32 %v1296_v60, 0.0  ;;  %v1556_v47 = vmax.f32 %v1426_v38, 0.0 }
 0x24e   :  { %v1300_v37 = vpop.f32.mrb[76].mxu0  ;;  %v1430_v24 = vpop.f32.mrb[44].mxu1 }
 0x24f   :  { %v2095_v55 = vpack.c.bf16 %v1530_v61, %v1529_v25  ;;  %v3273_v54 = vpack.c.bf16 %v1556_v47, %v1555_v57  ;;  %v1302_v20 = vpop.f32.mrb[77].mxu0  ;;  %v1432_v23 = vpop.f32.mrb[45].mxu1  ;;  %v1301_v51 = vadd.f32 %v1300_v37, %v3086_v31  ;;  %v1431_v44 = vadd.f32 %v1430_v24, %v3151_v0 }
 0x251   :  { %2096 = vmatprep.subr.bf16.mxu0 %v2095_v55  ;;  %v1531_v7 = vmax.f32 %v1301_v51, 0.0  ;;  %v1557_v35 = vmax.f32 %v1431_v44, 0.0 }
 0x252   :  { %v1305_v19 = vpop.f32.mrb[78].mxu0  ;;  %v1435_v22 = vpop.f32.mrb[46].mxu1  ;;  %2098 = vmatpush3.bf16.msra.mxu0 %v3200_v39 }
 0x253   :  { %v1306_v8 = vadd.f32 %v1305_v19, %v3084_v30  ;;  %v1436_v4 = vadd.f32 %v1435_v22, %v3149_v63  ;;  %v1307_v10 = vpop.f32.mrb[79].mxu0  ;;  %v1437_v53 = vpop.f32.mrb[47].mxu1 }
 0x255   :  { %v1532_v11 = vmax.f32 %v1306_v8, 0.0  ;;  %v1558_v1 = vmax.f32 %v1436_v4, 0.0 }
 0x256   :  { %v1310_v9 = vpop.f32.mrb[80].mxu0  ;;  %v1440_v14 = vpop.f32.mrb[48].mxu1 }
 0x257   :  { %v2099_v31 = vpack.c.bf16 %v1532_v11, %v1531_v7  ;;  %v2119_v60 = vpack.c.bf16 %v1558_v1, %v1557_v35  ;;  %v1312_v0 = vpop.f32.mrb[81].mxu0  ;;  %v1442_v38 = vpop.f32.mrb[49].mxu1  ;;  %v1311_v58 = vadd.f32 %v1310_v9, %v3112_v41  ;;  %v1441_v39 = vadd.f32 %v1440_v14, %v3159_v6  ;;  %v1576_v1 = vld [vmem:[%s3348_s5 + $0x18] sm:$0xff] }
 0x259   :  { %2100 = vmatprep.subr.bf16.mxu0 %v2099_v31  ;;  %v1533_v47 = vmax.f32 %v1311_v58, 0.0  ;;  %v1559_v37 = vmax.f32 %v1441_v39, 0.0 }
 0x25a   :  { %v1315_v30 = vpop.f32.mrb[82].mxu0  ;;  %v1445_v27 = vpop.f32.mrb[50].mxu1  ;;  %2102 = vmatpush3.bf16.msra.mxu0 %v3212_v34 }
 0x25b   :  { %v1316_v63 = vadd.f32 %v1315_v30, %v3110_v40  ;;  %v1446_v25 = vadd.f32 %v1445_v27, %v3157_v5  ;;  %v1447_v57 = vpop.f32.mrb[51].mxu1  ;;  %v1317_v61 = vpop.f32.mrb[83].mxu0 }
 0x25d   :  { %v1534_v24 = vmax.f32 %v1316_v63, 0.0  ;;  %v1560_v55 = vmax.f32 %v1446_v25, 0.0 }
 0x25e   :  { %v1450_v20 = vpop.f32.mrb[52].mxu1 }
 0x25f   :  { %v2103_v23 = vpack.c.bf16 %v1534_v24, %v1533_v47  ;;  %v2123_v41 = vpack.c.bf16 %v1560_v55, %v1559_v37  ;;  %v1452_v51 = vpop.f32.mrb[53].mxu1  ;;  %v1451_v6 = vadd.f32 %v1450_v20, %v3170_v13 }
 0x261   :  { %2104 = vmatprep.subr.bf16.mxu0 %v2103_v23  ;;  %v1561_v34 = vmax.f32 %v1451_v6, 0.0  ;;  %v3352_v23 = vmov 0.0|0.0  }
 0x262   :  { %v1455_v44 = vpop.f32.mrb[54].mxu1  ;;  %2106 = vmatpush3.bf16.msra.mxu0 %v3222_v29 }
 0x263   :  { %v1456_v40 = vadd.f32 %v1455_v44, %v3168_v12  ;;  %2108 = vmatprep.subr.bf16.mxu0 %v3180_v18  ;;  %v1457_v5 = vpop.f32.mrb[55].mxu1 }
 0x265   :  { %v1562_v19 = vmax.f32 %v1456_v40, 0.0 }
 0x266   :  { %v1460_v22 = vpop.f32.mrb[56].mxu1  ;;  %2110 = vmatpush3.bf16.msra.mxu0 %v3234_v17 }
 0x267   :  { %v2127_v8 = vpack.c.bf16 %v1562_v19, %v1561_v34  ;;  %2112 = vmatprep.subr.bf16.mxu0 %v3190_v21  ;;  %v1462_v4 = vpop.f32.mrb[57].mxu1  ;;  %v1461_v13 = vadd.f32 %v1460_v22, %v3184_v16  ;;  %v1573_v21 = vld [vmem:[%s3348_s5] sm:$0xff]  ;;  %v1586_v34 = vpop.permute.xlu0 %1585 }
 0x269   :  { %v1563_v18 = vmax.f32 %v1461_v13, 0.0 }
 0x26a   :  { %v1465_v10 = vpop.f32.mrb[58].mxu1  ;;  %2114 = vmatpush3.bf16.msra.mxu0 %v3242_v48  ;;  %v1578_v48 = vld [vmem:[%s3348_s5 + $0x28] sm:$0xff] }
 0x26b   :  { %v1466_v29 = vadd.f32 %v1465_v10, %v3182_v50  ;;  %2116 = vmatprep.subr.bf16.mxu0 %v3202_v3  ;;  %v1467_v12 = vpop.f32.mrb[59].mxu1  ;;  %v1591_v10 = vpop.permute.xlu1 %1590 }
 0x26d   :  { %v1564_v53 = vmax.f32 %v1466_v29, 0.0 }
 0x26e   :  { %v1470_v7 = vpop.f32.mrb[60].mxu1  ;;  %2118 = vmatpush3.bf16.msra.mxu0 %v3253_v15  ;;  %v1577_v15 = vld [vmem:[%s3348_s5 + $0x20] sm:$0xff] }
 0x26f   :  { %v2131_v17 = vpack.c.bf16 %v1564_v53, %v1563_v18  ;;  %2120 = vmatprep.subr.bf16.mxu0 %v2119_v60  ;;  %v1472_v16 = vpop.f32.mrb[61].mxu1  ;;  %v1471_v50 = vadd.f32 %v1470_v7, %v3206_v43 }
 0x270   :  { %v1745_v16 = vld [vmem:[%s3349_s7] sm:$0xff] }
 0x271   :  { %1658 = vmatmul.mubr.f32.vlgmr.msra.gmra.mrb[84].mxu0 %v1573_v21  ;;  %v1565_v9 = vmax.f32 %v1471_v50, 0.0 }
 0x272   :  { %v1475_v3 = vpop.f32.mrb[62].mxu1  ;;  %2122 = vmatpush3.bf16.msra.mxu0 %v3214_v26  ;;  %1662 = vmatprep.mubr.f32.mxu0 %v1578_v48  ;;  %v1750_v48 = vpop.permute.xlu0 %1749 }
 0x273   :  { %v1476_v35 = vadd.f32 %v1475_v3, %v3204_v42  ;;  %2124 = vmatprep.subr.bf16.mxu0 %v2123_v41  ;;  %v1477_v11 = vpop.f32.mrb[63].mxu1 }
 0x275   :  { %v1566_v14 = vmax.f32 %v1476_v35, 0.0  ;;  %1663 = vmatmul.mubr.f32.gmra.mrb[86].mxu0 %v1577_v15 }
 0x276   :  { %v1480_v43 = vpop.f32.mrb[64].mxu1  ;;  %2126 = vmatpush3.bf16.msra.mxu0 %v3224_v36  ;;  %1732 = vmatprep.mubr.f32.mxu0 %v1576_v1 }
 0x277   :  { %v2135_v26 = vpack.c.bf16 %v1566_v14, %v1565_v9  ;;  %2128 = vmatprep.subr.bf16.mxu0 %v2127_v8  ;;  %v1482_v31 = vpop.f32.mrb[65].mxu1  ;;  %v1481_v60 = vadd.f32 %v1480_v43, %v3228_v33 }
 0x279   :  { %v1567_v58 = vmax.f32 %v1481_v60, 0.0 }
 0x27a   :  { %v1485_v0 = vpop.f32.mrb[66].mxu1  ;;  %2130 = vmatpush3.bf16.msra.mxu0 %v3236_v46 }
 0x27b   :  { %v1486_v42 = vadd.f32 %v1485_v0, %v3226_v32  ;;  %2132 = vmatprep.subr.bf16.mxu0 %v2131_v17  ;;  %v1487_v38 = vpop.f32.mrb[67].mxu1 }
 0x27d   :  { %v1568_v39 = vmax.f32 %v1486_v42, 0.0 }
 0x27e   :  { %v1490_v30 = vpop.f32.mrb[68].mxu1  ;;  %2134 = vmatpush3.bf16.msra.mxu0 %v3244_v52 }
 0x27f   :  { %v2139_v27 = vpack.c.bf16 %v1568_v39, %v1567_v58  ;;  %2136 = vmatprep.subr.bf16.mxu0 %v2135_v26  ;;  %v1492_v36 = vpop.f32.mrb[69].mxu1  ;;  %v1491_v63 = vadd.f32 %v1490_v30, %v3248_v49 }
 0x281   :  { %v1569_v32 = vmax.f32 %v1491_v63, 0.0 }
 0x282   :  { %v1495_v25 = vpop.f32.mrb[70].mxu1  ;;  %2138 = vmatpush3.bf16.msra.mxu0 %v3255_v56 }
 0x283   :  { %v1496_v33 = vadd.f32 %v1495_v25, %v3246_v2  ;;  %2140 = vmatprep.subr.bf16.mxu0 %v2139_v27  ;;  %v1497_v46 = vpop.f32.mrb[71].mxu1 }
 0x285   :  { %v1570_v57 = vmax.f32 %v1496_v33, 0.0 }
 0x286   :  { %v1500_v61 = vpop.f32.mrb[72].mxu1  ;;  %2142 = vmatpush3.bf16.msra.mxu0 %v3259_v62  ;;  %v1575_v62 = vld [vmem:[%s3348_s5 + $0x10] sm:$0xff] }
 0x287   :  { %v2143_v47 = vpack.c.bf16 %v1570_v57, %v1569_v32  ;;  %v1502_v37 = vpop.f32.mrb[73].mxu1  ;;  %v1501_v52 = vadd.f32 %v1500_v61, %v3263_v28  ;;  %v1580_v28 = vld [vmem:[%s3348_s5 + $0x38] sm:$0xff] }
 0x289   :  { %2144 = vmatprep.subr.bf16.mxu0 %v2143_v47  ;;  %v1571_v55 = vmax.f32 %v1501_v52, 0.0 }
 0x28a   :  { %v1505_v24 = vpop.f32.mrb[74].mxu1  ;;  %2146 = vmatpush3.bf16.msra.mxu0 %v3268_v45  ;;  %v2195_v45 = vmov 0.0  }
 0x28b   :  { %v1506_v49 = vadd.f32 %v1505_v24, %v3261_v59  ;;  %v1507_v56 = vpop.f32.mrb[75].mxu1  ;;  %v1579_v59 = vld [vmem:[%s3348_s5 + $0x30] sm:$0xff] }
 0x28d   :  { %v1572_v2 = vmax.f32 %v1506_v49, 0.0 }
 0x28f   :  { %v2147_v20 = vpack.c.bf16 %v1572_v2, %v1571_v55 }
 0x291   :  { %2148 = vmatprep.subr.bf16.mxu0 %v2147_v20 }
 0x292   :  { %2150 = vmatpush3.bf16.msra.mxu0 %v3273_v54 }
 0x293   :  { %2151 = vmatprep.subr.bf16.mxu0 %v3352_v23 }
 0x295   :  { %1733 = vmatmul.mubr.f32.vlgmr.msra.gmra.mrb[88].mxu0 %v1575_v62 }
 0x296   :  { %1737 = vmatprep.mubr.f32.mxu0 %v1580_v28 }
 0x299   :  { %1738 = vmatmul.mubr.f32.gmra.mrb[90].mxu0 %v1579_v59 }
 0x29a   :  { %2032 = vmatprep.mubr.msk.f32.mxu0 %vm2194_vm1, %v2195_v45 }
 0x344   :  { %v1929_v54 = vpop.f32.mrb[84].mxu0 }
 0x345   :  { %v1930_v41 = vpop.f32.mrb[85].mxu0 }
 0x346   :  { %v1931_v51 = vadd.f32 %v1930_v41, %v1929_v54 }
 0x348   :  { %v1932_v6 = vpop.f32.mrb[86].mxu0  ;;  %v1660_v22 = vadd.f32 %v1931_v51, %v1586_v34 }
 0x349   :  { %v1933_v44 = vpop.f32.mrb[87].mxu0 }
 0x34a   :  { %v1934_v40 = vadd.f32 %v1933_v44, %v1932_v6 }
 0x34c   :  { %v1665_v12 = vadd.f32 %v1934_v40, %v1591_v10 }
 0x368   :  { %v1967_v5 = vpop.f32.mrb[88].mxu0 }
 0x369   :  { %v1968_v19 = vpop.f32.mrb[89].mxu0 }
 0x36a   :  { %v1969_v8 = vadd.f32 %v1968_v19, %v1967_v5 }
 0x36c   :  { %v1735_v4 = vadd.f32 %v1969_v8, %v1660_v22  ;;  %v1970_v13 = vpop.f32.mrb[90].mxu0 }
 0x36d   :  { %v1971_v29 = vpop.f32.mrb[91].mxu0 }
 0x36e   :  { %v1972_v18 = vadd.f32 %v1971_v29, %v1970_v13  ;;  %v1743_v7 = vmax.f32 %v1735_v4, 0.0 }
 0x370   :  { %v1740_v53 = vadd.f32 %v1972_v18, %v1665_v12 }
 0x372   :  { %v1744_v21 = vmax.f32 %v1740_v53, 0.0 }
 0x374   :  { %v2152_v17 = vpack.c.bf16 %v1744_v21, %v1743_v7 }
 0x376   :  { %2153 = vmatpush3.bf16.msra.mxu0 %v2152_v17 }
 0x379   :  { %2033 = vmatmul.mubr.msk.f32.vlgmr.msra.gmra.mrb[92].mxu0 %vm258_vm0, %v1745_v16 }
 0x44c   :  { %v1821_v50 = vpop.f32.mrb[92].mxu0 }
 0x44d   :  { %v1822_v3 = vadd.f32 %v1821_v50, %v1750_v48  ;;  %v2034_v15 = vpop.f32.mrb[93].mxu0 }
 0x44f   :  { %1825 = vst [vmem:[%s3350_s9] sm:$0xff] %v1822_v3 }

</bundles_post_ra>
